<compile_context>
chip_gen: v5e
topology: v5e:2x2
jax: 0.10.0
libtpu: 0.0.40
codegen_flags: <defaults>
</compile_context>

<pallas_src>
import jax
import jax.numpy as jnp
from jax import lax
from jax.experimental import pallas as pl
from jax.experimental.pallas import tpu as pltpu

INPUT_SIZE = 6
HIDDEN = 32
OUTPUT_SIZE = 1
B = 2   # batch
T = 8   # sequence length


def _lstm_cell(x_t, h, c, w_ih, w_hh, b):
    """Pure-JAX LSTM cell (PyTorch semantics) — used only by the reference."""
    gates = (jnp.dot(x_t, w_ih, preferred_element_type=jnp.float32)
             + jnp.dot(h, w_hh, preferred_element_type=jnp.float32)
             + b)                                   # [B, 4H]
    H = h.shape[-1]
    i = jax.nn.sigmoid(gates[:, 0 * H:1 * H])
    f = jax.nn.sigmoid(gates[:, 1 * H:2 * H])
    g = jnp.tanh(gates[:, 2 * H:3 * H])
    o = jax.nn.sigmoid(gates[:, 3 * H:4 * H])
    c_new = f * c + i * g
    h_new = o * jnp.tanh(c_new)
    return h_new, c_new


def net_kernel(xc_ref,                               # [T*B, 2F]: [x(t) | x(T-1-t)]
               w0x_ref, b0_ref, whh0_ref,            # layer 0 (combined layout)
               w1blk_ref, whh1_ref,                  # layer 1 fwd
               w1r_ref, b1_ref,                      # layer 1 rev proj + biases
               wlin_ref, blin_ref,                   # final linear
               out_ref):                             # [B, 1]
    H = HIDDEN

    def act_consts(gw):
        # Recovery constants for the single-tanh trick: i/f/o lanes were
        # pre-scaled by 0.5 in the weights, so sigmoid(z) = 0.5*tanh(z/2)+0.5;
        # g lanes stay plain tanh.
        lane = lax.broadcasted_iota(jnp.int32, (1, 4 * gw), 1)
        is_g = (lane >= 2 * gw) & (lane < 3 * gw)
        scale = jnp.where(is_g, 1.0, 0.5).astype(jnp.float32)
        shift = jnp.where(is_g, 0.0, 0.5).astype(jnp.float32)
        return scale, shift

    sc0, sh0 = act_consts(2 * H)     # combined (both-direction) cells: 8H lanes
    sc1, sh1 = act_consts(H)         # fwd-only cells: 4H lanes

    def cell(xg, h, c, whh, gw, scale, shift):
        # xg already holds input-projection + bias; only the recurrent dot and
        # one tanh pass sit on the serialized path.
        gates = xg + jnp.dot(h, whh, preferred_element_type=jnp.float32)
        a = jnp.tanh(gates) * scale + shift          # i/f/o -> sigmoid, g -> tanh
        i = a[:, 0:gw]
        f = a[:, gw:2 * gw]
        g = a[:, 2 * gw:3 * gw]
        o = a[:, 3 * gw:4 * gw]
        c_new = f * c + i * g
        h_new = o * jnp.tanh(c_new)
        return h_new, c_new

    # ---- layer 0: one batched input projection (both directions, all steps) -
    xg0 = (jnp.dot(xc_ref[...], w0x_ref[...], preferred_element_type=jnp.float32)
           + b0_ref[...])                            # [T*B, 8H], time-major rows

    whh0 = whh0_ref[...]
    w1blk = w1blk_ref[...]
    w1r = w1r_ref[...]
    b1 = b1_ref[...]
    b1f = b1[0:1, :]
    b1r = b1[1:2, :]

    h0 = jnp.zeros((B, 2 * H), jnp.float32)          # (hf(t) | hr(T-1-t))
    c0 = jnp.zeros((B, 2 * H), jnp.float32)
    xg1 = [b1f] * T                                  # layer-1 fwd gate inputs
    xg1r_f = None
    xg1r_r = None
    for t in range(T):
        # Combined fwd(t) / rev(T-1-t) cell — one dot, one tanh pass, one update.
        h0, c0 = cell(xg0[t * B:(t + 1) * B, :], h0, c0, whh0, 2 * H, sc0, sh0)
        # Layer-1 input projection hidden under the recurrence (fills MXU slack):
        # block-diag w1blk routes hf(t) -> time-t gates, hr(T-1-t) -> time-(T-1-t).
        contrib = jnp.dot(h0, w1blk, preferred_element_type=jnp.float32)  # [B,8H]
        s = T - 1 - t
        xg1[t] = xg1[t] + contrib[:, 0:4 * H]
        xg1[s] = xg1[s] + contrib[:, 4 * H:8 * H]
        # Layer-1 reverse only ever consumes l0_out[T-1] = (hf(T-1), hr(T-1)).
        if t == 0:
            xg1r_r = jnp.dot(h0[:, H:2 * H], w1r[H:2 * H, :],
                             preferred_element_type=jnp.float32)
        if t == T - 1:
            xg1r_f = jnp.dot(h0[:, 0:H], w1r[0:H, :],
                             preferred_element_type=jnp.float32)

    # ---- layer 1 forward recurrence (8 unrolled steps) ----------------------
    whh1 = whh1_ref[...]
    h1 = jnp.zeros((B, H), jnp.float32)
    c1 = jnp.zeros((B, H), jnp.float32)
    for t in range(T):
        h1, c1 = cell(xg1[t], h1, c1, whh1, H, sc1, sh1)

    # ---- layer 1 reverse: only output[:, -1, :] is consumed downstream, which
    # for the reverse direction is its FIRST step (zero initial state) — a pure
    # activation pass, no recurrent dot.  Valid only because the model reads
    # just the last timestep.
    ar = jnp.tanh(xg1r_f + xg1r_r + b1r) * sc1 + sh1
    ir = ar[:, 0:H]
    gr = ar[:, 2 * H:3 * H]
    orr = ar[:, 3 * H:4 * H]
    h1r = orr * jnp.tanh(ir * gr)                    # c = f*0 + i*g

    # ---- X[:, -1, :] -> dropout (identity, eval) -> linear -> sigmoid -------
    wlin = wlin_ref[...]                             # [1, 2H]
    z = (jnp.sum(h1 * wlin[:, 0:H], axis=1, keepdims=True)
         + jnp.sum(h1r * wlin[:, H:2 * H], axis=1, keepdims=True)
         + blin_ref[...])
    out_ref[...] = jax.nn.sigmoid(z)


@jax.jit
def net_forward(x, kparams):
    """x: [B, T, F] float32 (batch_first, like PyTorch). kparams: prepare_params."""
    b, t, f = x.shape
    # Layout plumbing only (no compute): time-major rows [x(t) | x(T-1-t)] so one
    # in-kernel dot covers both directions and per-step slices are contiguous.
    x_tm = jnp.transpose(x, (1, 0, 2))               # [T, B, F]
    x_rev = x_tm[::-1]                               # time-reversed copy
    xcomb = jnp.concatenate([x_tm, x_rev], axis=-1).reshape(t * b, 2 * f)
    flat = (xcomb,) + tuple(kparams)
    return pl.pallas_call(
        net_kernel,
        out_shape=jax.ShapeDtypeStruct((b, OUTPUT_SIZE), jnp.float32),
        in_specs=[pl.BlockSpec(memory_space=pltpu.MemorySpace.VMEM)] * len(flat),
        out_specs=pl.BlockSpec(memory_space=pltpu.MemorySpace.VMEM),
    )(*flat)


def prepare_params(params):
    """One-time host-side repack of PyTorch-layout params into kernel layout."""
    (wih0f, whh0f, b0f, wih0r, whh0r, b0r,
     wih1f, whh1f, b1f, wih1r, whh1r, b1r, wlin, blin) = params
    H = HIDDEN
    F = INPUT_SIZE

    def scale_ifo(a):
        # sigmoid(z) = 0.5*tanh(z/2) + 0.5  ->  halve the i/f/o columns, keep g.
        s = jnp.concatenate([jnp.full((1, H), 0.5, jnp.float32),
                             jnp.full((1, H), 0.5, jnp.float32),
                             jnp.ones((1, H), jnp.float32),
                             jnp.full((1, H), 0.5, jnp.float32)], axis=1)
        return a * s

    def interleave(af, ar):
        # gate-major-mixed column order: (i_f,i_r | f_f,f_r | g_f,g_r | o_f,o_r)
        cols = []
        for gi in range(4):
            cols.append(af[:, gi * H:(gi + 1) * H])
            cols.append(ar[:, gi * H:(gi + 1) * H])
        return jnp.concatenate(cols, axis=1)

    w0f, w0r = scale_ifo(wih0f), scale_ifo(wih0r)
    r0f, r0r = scale_ifo(whh0f), scale_ifo(whh0r)
    b0fs, b0rs = scale_ifo(b0f), scale_ifo(b0r)
    w1f = scale_ifo(wih1f)
    w1rv = scale_ifo(wih1r)
    r1f = scale_ifo(whh1f)
    b1fs, b1rs = scale_ifo(b1f), scale_ifo(b1r)

    zF = jnp.zeros((F, 4 * H), jnp.float32)
    zH = jnp.zeros((H, 4 * H), jnp.float32)

    # Layer 0: kernel input rows are [x(t) | x(T-1-t)]; fwd gate columns see
    # only the top F rows, rev gate columns only the bottom F rows.
    w0x = interleave(jnp.concatenate([w0f, zF], axis=0),
                     jnp.concatenate([zF, w0r], axis=0))           # [2F, 8H]
    b0 = interleave(b0fs, b0rs)                                    # [1, 8H]
    # Layer 0: block-diagonal recurrent weight for the combined [B, 2H] state.
    whh0 = interleave(jnp.concatenate([r0f, zH], axis=0),
                      jnp.concatenate([zH, r0r], axis=0))          # [2H, 8H]

    # Layer 1 fwd input projection, block form: hf -> columns [0,4H) (its own
    # timestep), hr -> columns [4H,8H) (its own timestep), plain i|f|g|o order.
    w1blk = jnp.concatenate(
        [jnp.concatenate([w1f[:H], zH], axis=1),
         jnp.concatenate([zH, w1f[H:]], axis=1)], axis=0)          # [2H, 8H]

    b1 = jnp.concatenate([b1fs, b1rs], axis=0)                     # [2, 4H]

    return (w0x, b0, whh0,
            w1blk, r1f,
            w1rv, b1,
            wlin.reshape(1, 2 * H), blin)


def init_params(key):
    """Deterministic synthetic parameters, PyTorch-style uniform(-k, k)."""
    ks = list(jax.random.split(key, 16))
    k_lstm = 1.0 / jnp.sqrt(HIDDEN)

    def cell_params(k1, k2, k3, in_dim):
        w_ih = jax.random.uniform(k1, (in_dim, 4 * HIDDEN), jnp.float32,
                                  -k_lstm, k_lstm)
        w_hh = jax.random.uniform(k2, (HIDDEN, 4 * HIDDEN), jnp.float32,
                                  -k_lstm, k_lstm)
        # b = b_ih + b_hh, reshaped for broadcast over the batch dim
        b = jax.random.uniform(k3, (2, 4 * HIDDEN), jnp.float32,
                               -k_lstm, k_lstm).sum(axis=0).reshape(1, 4 * HIDDEN)
        return w_ih, w_hh, b

    p = []
    p += cell_params(ks[0], ks[1], ks[2], INPUT_SIZE)        # layer 0 fwd
    p += cell_params(ks[3], ks[4], ks[5], INPUT_SIZE)        # layer 0 rev
    p += cell_params(ks[6], ks[7], ks[8], 2 * HIDDEN)        # layer 1 fwd
    p += cell_params(ks[9], ks[10], ks[11], 2 * HIDDEN)      # layer 1 rev

    k_lin = 1.0 / jnp.sqrt(2.0 * HIDDEN)
    w_lin = jax.random.uniform(ks[12], (2 * HIDDEN, OUTPUT_SIZE), jnp.float32,
                               -k_lin, k_lin)
    b_lin = jax.random.uniform(ks[13], (1, OUTPUT_SIZE), jnp.float32,
                               -k_lin, k_lin)
    p += [w_lin, b_lin]
    return tuple(p)


def net_forward_ref(x, params):
    """Pure-JAX reference with identical semantics (for correctness check)."""
    (wih0f, whh0f, b0f, wih0r, whh0r, b0r,
     wih1f, whh1f, b1f, wih1r, whh1r, b1r, wlin, blin) = params
    b, t, _ = x.shape
    zeros = jnp.zeros((b, HIDDEN), jnp.float32)

    def run(seq, w_ih, w_hh, bias, reverse):
        order = range(t - 1, -1, -1) if reverse else range(t)
        h, c = zeros, zeros
        outs = [None] * t
        for i in order:
            h, c = _lstm_cell(seq[:, i, :], h, c, w_ih, w_hh, bias)
            outs[i] = h
        return jnp.stack(outs, axis=1)  # [B, T, H]

    l0 = jnp.concatenate([run(x, wih0f, whh0f, b0f, False),
                          run(x, wih0r, whh0r, b0r, True)], axis=-1)
    l1 = jnp.concatenate([run(l0, wih1f, whh1f, b1f, False),
                          run(l0, wih1r, whh1r, b1r, True)], axis=-1)
    feat = l1[:, -1, :]
    return jax.nn.sigmoid(feat @ wlin + blin)


if __name__ == "__main__":
    key = jax.random.PRNGKey(0)
    k_x, k_p = jax.random.split(key)
    x = jax.random.normal(k_x, (B, T, INPUT_SIZE), jnp.float32)
    params = init_params(k_p)
    kparams = prepare_params(params)      # one-time repack, outside the jit

    out = net_forward(x, kparams)
    out = jax.block_until_ready(out)

    ref = net_forward_ref(x, params)
    assert out.shape == (B, OUTPUT_SIZE)
    assert jnp.allclose(out, ref, atol=1e-5, rtol=1e-5), (out, ref)
    print("KERNEL_OK")
</pallas_src>

<mosaic_0001>
module attributes {stable_mosaic.version = 11 : i64} {
  func.func @net_kernel(%arg0: memref<16x12xf32, #tpu.memory_space<vmem>>, %arg1: memref<12x256xf32, #tpu.memory_space<vmem>>, %arg2: memref<1x256xf32, #tpu.memory_space<vmem>>, %arg3: memref<64x256xf32, #tpu.memory_space<vmem>>, %arg4: memref<64x256xf32, #tpu.memory_space<vmem>>, %arg5: memref<32x128xf32, #tpu.memory_space<vmem>>, %arg6: memref<64x128xf32, #tpu.memory_space<vmem>>, %arg7: memref<2x128xf32, #tpu.memory_space<vmem>>, %arg8: memref<1x64xf32, #tpu.memory_space<vmem>>, %arg9: memref<1x1xf32, #tpu.memory_space<vmem>>, %arg10: memref<2x1xf32, #tpu.memory_space<vmem>>) attributes {dimension_semantics = [], scalar_prefetch = 0 : i64, scratch_operands = 0 : i64, tpu.core_type = #tpu.core_type<tc>} {
    %0 = tpu.iota {dimensions = array<i32: 1>} : vector<1x256xi32>
    %c128_i32 = arith.constant 128 : i32
    %1 = vector.broadcast %c128_i32 : i32 to vector<1x256xi32>
    %2 = arith.cmpi sge, %0, %1 : vector<1x256xi32>
    %c192_i32 = arith.constant 192 : i32
    %3 = vector.broadcast %c192_i32 : i32 to vector<1x256xi32>
    %4 = arith.cmpi slt, %0, %3 : vector<1x256xi32>
    %5 = arith.andi %2, %4 : vector<1x256xi1>
    %cst = arith.constant 1.000000e+00 : f32
    %cst_0 = arith.constant 5.000000e-01 : f32
    %6 = vector.broadcast %cst : f32 to vector<1x256xf32>
    %7 = vector.broadcast %cst_0 : f32 to vector<1x256xf32>
    %8 = arith.select %5, %6, %7 : vector<1x256xi1>, vector<1x256xf32>
    %cst_1 = arith.constant 0.000000e+00 : f32
    %cst_2 = arith.constant 5.000000e-01 : f32
    %9 = vector.broadcast %cst_1 : f32 to vector<1x256xf32>
    %10 = vector.broadcast %cst_2 : f32 to vector<1x256xf32>
    %11 = arith.select %5, %9, %10 : vector<1x256xi1>, vector<1x256xf32>
    %12 = tpu.iota {dimensions = array<i32: 1>} : vector<1x128xi32>
    %c64_i32 = arith.constant 64 : i32
    %13 = vector.broadcast %c64_i32 : i32 to vector<1x128xi32>
    %14 = arith.cmpi sge, %12, %13 : vector<1x128xi32>
    %c96_i32 = arith.constant 96 : i32
    %15 = vector.broadcast %c96_i32 : i32 to vector<1x128xi32>
    %16 = arith.cmpi slt, %12, %15 : vector<1x128xi32>
    %17 = arith.andi %14, %16 : vector<1x128xi1>
    %cst_3 = arith.constant 1.000000e+00 : f32
    %cst_4 = arith.constant 5.000000e-01 : f32
    %18 = vector.broadcast %cst_3 : f32 to vector<1x128xf32>
    %19 = vector.broadcast %cst_4 : f32 to vector<1x128xf32>
    %20 = arith.select %17, %18, %19 : vector<1x128xi1>, vector<1x128xf32>
    %cst_5 = arith.constant 0.000000e+00 : f32
    %cst_6 = arith.constant 5.000000e-01 : f32
    %21 = vector.broadcast %cst_5 : f32 to vector<1x128xf32>
    %22 = vector.broadcast %cst_6 : f32 to vector<1x128xf32>
    %23 = arith.select %17, %21, %22 : vector<1x128xi1>, vector<1x128xf32>
    %c0 = arith.constant 0 : index
    %c0_7 = arith.constant 0 : index
    %24 = vector.load %arg0[%c0, %c0_7] : memref<16x12xf32, #tpu.memory_space<vmem>>, vector<16x12xf32>
    %c0_8 = arith.constant 0 : index
    %c0_9 = arith.constant 0 : index
    %25 = vector.load %arg1[%c0_8, %c0_9] : memref<12x256xf32, #tpu.memory_space<vmem>>, vector<12x256xf32>
    %cst_10 = arith.constant dense<0.000000e+00> : vector<16x256xf32>
    %26 = tpu.matmul %24, %25, %cst_10 {dimension_numbers = #tpu.dot_dimension_numbers<[1], [0], [0], [1], [0, 0, 1, 1], [], []>} : vector<16x12xf32>, vector<12x256xf32>, vector<16x256xf32> -> vector<16x256xf32>
    %c0_11 = arith.constant 0 : index
    %c0_12 = arith.constant 0 : index
    %27 = vector.load %arg2[%c0_11, %c0_12] : memref<1x256xf32, #tpu.memory_space<vmem>>, vector<1x256xf32>
    %28 = vector.broadcast %27 : vector<1x256xf32> to vector<16x256xf32>
    %29 = arith.addf %26, %28 : vector<16x256xf32>
    %c0_13 = arith.constant 0 : index
    %c0_14 = arith.constant 0 : index
    %30 = vector.load %arg3[%c0_13, %c0_14] : memref<64x256xf32, #tpu.memory_space<vmem>>, vector<64x256xf32>
    %c0_15 = arith.constant 0 : index
    %c0_16 = arith.constant 0 : index
    %31 = vector.load %arg4[%c0_15, %c0_16] : memref<64x256xf32, #tpu.memory_space<vmem>>, vector<64x256xf32>
    %c0_17 = arith.constant 0 : index
    %c0_18 = arith.constant 0 : index
    %32 = vector.load %arg6[%c0_17, %c0_18] : memref<64x128xf32, #tpu.memory_space<vmem>>, vector<64x128xf32>
    %c0_19 = arith.constant 0 : index
    %c0_20 = arith.constant 0 : index
    %33 = vector.load %arg7[%c0_19, %c0_20] : memref<2x128xf32, #tpu.memory_space<vmem>>, vector<2x128xf32>
    %34 = vector.extract_strided_slice %33 {offsets = [0, 0], sizes = [1, 128], strides = [1, 1]} : vector<2x128xf32> to vector<1x128xf32>
    %35 = vector.extract_strided_slice %33 {offsets = [1, 0], sizes = [1, 128], strides = [1, 1]} : vector<2x128xf32> to vector<1x128xf32>
    %cst_21 = arith.constant 0.000000e+00 : f32
    %36 = vector.broadcast %cst_21 : f32 to vector<2x64xf32>
    %cst_22 = arith.constant 0.000000e+00 : f32
    %37 = vector.broadcast %cst_22 : f32 to vector<2x64xf32>
    %38 = vector.extract_strided_slice %29 {offsets = [0, 0], sizes = [2, 256], strides = [1, 1]} : vector<16x256xf32> to vector<2x256xf32>
    %cst_23 = arith.constant dense<0.000000e+00> : vector<2x256xf32>
    %39 = tpu.matmul %36, %30, %cst_23 {dimension_numbers = #tpu.dot_dimension_numbers<[1], [0], [0], [1], [0, 0, 1, 1], [], []>} : vector<2x64xf32>, vector<64x256xf32>, vector<2x256xf32> -> vector<2x256xf32>
    %40 = arith.addf %38, %39 : vector<2x256xf32>
    %41 = math.tanh %40 : vector<2x256xf32>
    %42 = vector.broadcast %8 : vector<1x256xf32> to vector<2x256xf32>
    %43 = arith.mulf %41, %42 : vector<2x256xf32>
    %44 = vector.broadcast %11 : vector<1x256xf32> to vector<2x256xf32>
    %45 = arith.addf %43, %44 : vector<2x256xf32>
    %46 = vector.extract_strided_slice %45 {offsets = [0, 0], sizes = [2, 64], strides = [1, 1]} : vector<2x256xf32> to vector<2x64xf32>
    %47 = vector.extract_strided_slice %45 {offsets = [0, 64], sizes = [2, 64], strides = [1, 1]} : vector<2x256xf32> to vector<2x64xf32>
    %48 = vector.extract_strided_slice %45 {offsets = [0, 128], sizes = [2, 64], strides = [1, 1]} : vector<2x256xf32> to vector<2x64xf32>
    %49 = vector.extract_strided_slice %45 {offsets = [0, 192], sizes = [2, 64], strides = [1, 1]} : vector<2x256xf32> to vector<2x64xf32>
    %50 = arith.mulf %47, %37 : vector<2x64xf32>
    %51 = arith.mulf %46, %48 : vector<2x64xf32>
    %52 = arith.addf %50, %51 : vector<2x64xf32>
    %53 = math.tanh %52 : vector<2x64xf32>
    %54 = arith.mulf %49, %53 : vector<2x64xf32>
    %cst_24 = arith.constant dense<0.000000e+00> : vector<2x256xf32>
    %55 = tpu.matmul %54, %31, %cst_24 {dimension_numbers = #tpu.dot_dimension_numbers<[1], [0], [0], [1], [0, 0, 1, 1], [], []>} : vector<2x64xf32>, vector<64x256xf32>, vector<2x256xf32> -> vector<2x256xf32>
    %56 = vector.extract_strided_slice %55 {offsets = [0, 0], sizes = [2, 128], strides = [1, 1]} : vector<2x256xf32> to vector<2x128xf32>
    %57 = vector.broadcast %34 : vector<1x128xf32> to vector<2x128xf32>
    %58 = arith.addf %57, %56 : vector<2x128xf32>
    %59 = vector.extract_strided_slice %55 {offsets = [0, 128], sizes = [2, 128], strides = [1, 1]} : vector<2x256xf32> to vector<2x128xf32>
    %60 = vector.broadcast %34 : vector<1x128xf32> to vector<2x128xf32>
    %61 = arith.addf %60, %59 : vector<2x128xf32>
    %62 = vector.extract_strided_slice %54 {offsets = [0, 32], sizes = [2, 32], strides = [1, 1]} : vector<2x64xf32> to vector<2x32xf32>
    %63 = vector.extract_strided_slice %32 {offsets = [32, 0], sizes = [32, 128], strides = [1, 1]} : vector<64x128xf32> to vector<32x128xf32>
    %cst_25 = arith.constant dense<0.000000e+00> : vector<2x128xf32>
    %64 = tpu.matmul %62, %63, %cst_25 {dimension_numbers = #tpu.dot_dimension_numbers<[1], [0], [0], [1], [0, 0, 1, 1], [], []>} : vector<2x32xf32>, vector<32x128xf32>, vector<2x128xf32> -> vector<2x128xf32>
    %65 = vector.extract_strided_slice %29 {offsets = [2, 0], sizes = [2, 256], strides = [1, 1]} : vector<16x256xf32> to vector<2x256xf32>
    %cst_26 = arith.constant dense<0.000000e+00> : vector<2x256xf32>
    %66 = tpu.matmul %54, %30, %cst_26 {dimension_numbers = #tpu.dot_dimension_numbers<[1], [0], [0], [1], [0, 0, 1, 1], [], []>} : vector<2x64xf32>, vector<64x256xf32>, vector<2x256xf32> -> vector<2x256xf32>
    %67 = arith.addf %65, %66 : vector<2x256xf32>
    %68 = math.tanh %67 : vector<2x256xf32>
    %69 = vector.broadcast %8 : vector<1x256xf32> to vector<2x256xf32>
    %70 = arith.mulf %68, %69 : vector<2x256xf32>
    %71 = vector.broadcast %11 : vector<1x256xf32> to vector<2x256xf32>
    %72 = arith.addf %70, %71 : vector<2x256xf32>
    %73 = vector.extract_strided_slice %72 {offsets = [0, 0], sizes = [2, 64], strides = [1, 1]} : vector<2x256xf32> to vector<2x64xf32>
    %74 = vector.extract_strided_slice %72 {offsets = [0, 64], sizes = [2, 64], strides = [1, 1]} : vector<2x256xf32> to vector<2x64xf32>
    %75 = vector.extract_strided_slice %72 {offsets = [0, 128], sizes = [2, 64], strides = [1, 1]} : vector<2x256xf32> to vector<2x64xf32>
    %76 = vector.extract_strided_slice %72 {offsets = [0, 192], sizes = [2, 64], strides = [1, 1]} : vector<2x256xf32> to vector<2x64xf32>
    %77 = arith.mulf %74, %52 : vector<2x64xf32>
    %78 = arith.mulf %73, %75 : vector<2x64xf32>
    %79 = arith.addf %77, %78 : vector<2x64xf32>
    %80 = math.tanh %79 : vector<2x64xf32>
    %81 = arith.mulf %76, %80 : vector<2x64xf32>
    %cst_27 = arith.constant dense<0.000000e+00> : vector<2x256xf32>
    %82 = tpu.matmul %81, %31, %cst_27 {dimension_numbers = #tpu.dot_dimension_numbers<[1], [0], [0], [1], [0, 0, 1, 1], [], []>} : vector<2x64xf32>, vector<64x256xf32>, vector<2x256xf32> -> vector<2x256xf32>
    %83 = vector.extract_strided_slice %82 {offsets = [0, 0], sizes = [2, 128], strides = [1, 1]} : vector<2x256xf32> to vector<2x128xf32>
    %84 = vector.broadcast %34 : vector<1x128xf32> to vector<2x128xf32>
    %85 = arith.addf %84, %83 : vector<2x128xf32>
    %86 = vector.extract_strided_slice %82 {offsets = [0, 128], sizes = [2, 128], strides = [1, 1]} : vector<2x256xf32> to vector<2x128xf32>
    %87 = vector.broadcast %34 : vector<1x128xf32> to vector<2x128xf32>
    %88 = arith.addf %87, %86 : vector<2x128xf32>
    %89 = vector.extract_strided_slice %29 {offsets = [4, 0], sizes = [2, 256], strides = [1, 1]} : vector<16x256xf32> to vector<2x256xf32>
    %cst_28 = arith.constant dense<0.000000e+00> : vector<2x256xf32>
    %90 = tpu.matmul %81, %30, %cst_28 {dimension_numbers = #tpu.dot_dimension_numbers<[1], [0], [0], [1], [0, 0, 1, 1], [], []>} : vector<2x64xf32>, vector<64x256xf32>, vector<2x256xf32> -> vector<2x256xf32>
    %91 = arith.addf %89, %90 : vector<2x256xf32>
    %92 = math.tanh %91 : vector<2x256xf32>
    %93 = vector.broadcast %8 : vector<1x256xf32> to vector<2x256xf32>
    %94 = arith.mulf %92, %93 : vector<2x256xf32>
    %95 = vector.broadcast %11 : vector<1x256xf32> to vector<2x256xf32>
    %96 = arith.addf %94, %95 : vector<2x256xf32>
    %97 = vector.extract_strided_slice %96 {offsets = [0, 0], sizes = [2, 64], strides = [1, 1]} : vector<2x256xf32> to vector<2x64xf32>
    %98 = vector.extract_strided_slice %96 {offsets = [0, 64], sizes = [2, 64], strides = [1, 1]} : vector<2x256xf32> to vector<2x64xf32>
    %99 = vector.extract_strided_slice %96 {offsets = [0, 128], sizes = [2, 64], strides = [1, 1]} : vector<2x256xf32> to vector<2x64xf32>
    %100 = vector.extract_strided_slice %96 {offsets = [0, 192], sizes = [2, 64], strides = [1, 1]} : vector<2x256xf32> to vector<2x64xf32>
    %101 = arith.mulf %98, %79 : vector<2x64xf32>
    %102 = arith.mulf %97, %99 : vector<2x64xf32>
    %103 = arith.addf %101, %102 : vector<2x64xf32>
    %104 = math.tanh %103 : vector<2x64xf32>
    %105 = arith.mulf %100, %104 : vector<2x64xf32>
    %cst_29 = arith.constant dense<0.000000e+00> : vector<2x256xf32>
    %106 = tpu.matmul %105, %31, %cst_29 {dimension_numbers = #tpu.dot_dimension_numbers<[1], [0], [0], [1], [0, 0, 1, 1], [], []>} : vector<2x64xf32>, vector<64x256xf32>, vector<2x256xf32> -> vector<2x256xf32>
    %107 = vector.extract_strided_slice %106 {offsets = [0, 0], sizes = [2, 128], strides = [1, 1]} : vector<2x256xf32> to vector<2x128xf32>
    %108 = vector.broadcast %34 : vector<1x128xf32> to vector<2x128xf32>
    %109 = arith.addf %108, %107 : vector<2x128xf32>
    %110 = vector.extract_strided_slice %106 {offsets = [0, 128], sizes = [2, 128], strides = [1, 1]} : vector<2x256xf32> to vector<2x128xf32>
    %111 = vector.broadcast %34 : vector<1x128xf32> to vector<2x128xf32>
    %112 = arith.addf %111, %110 : vector<2x128xf32>
    %113 = vector.extract_strided_slice %29 {offsets = [6, 0], sizes = [2, 256], strides = [1, 1]} : vector<16x256xf32> to vector<2x256xf32>
    %cst_30 = arith.constant dense<0.000000e+00> : vector<2x256xf32>
    %114 = tpu.matmul %105, %30, %cst_30 {dimension_numbers = #tpu.dot_dimension_numbers<[1], [0], [0], [1], [0, 0, 1, 1], [], []>} : vector<2x64xf32>, vector<64x256xf32>, vector<2x256xf32> -> vector<2x256xf32>
    %115 = arith.addf %113, %114 : vector<2x256xf32>
    %116 = math.tanh %115 : vector<2x256xf32>
    %117 = vector.broadcast %8 : vector<1x256xf32> to vector<2x256xf32>
    %118 = arith.mulf %116, %117 : vector<2x256xf32>
    %119 = vector.broadcast %11 : vector<1x256xf32> to vector<2x256xf32>
    %120 = arith.addf %118, %119 : vector<2x256xf32>
    %121 = vector.extract_strided_slice %120 {offsets = [0, 0], sizes = [2, 64], strides = [1, 1]} : vector<2x256xf32> to vector<2x64xf32>
    %122 = vector.extract_strided_slice %120 {offsets = [0, 64], sizes = [2, 64], strides = [1, 1]} : vector<2x256xf32> to vector<2x64xf32>
    %123 = vector.extract_strided_slice %120 {offsets = [0, 128], sizes = [2, 64], strides = [1, 1]} : vector<2x256xf32> to vector<2x64xf32>
    %124 = vector.extract_strided_slice %120 {offsets = [0, 192], sizes = [2, 64], strides = [1, 1]} : vector<2x256xf32> to vector<2x64xf32>
    %125 = arith.mulf %122, %103 : vector<2x64xf32>
    %126 = arith.mulf %121, %123 : vector<2x64xf32>
    %127 = arith.addf %125, %126 : vector<2x64xf32>
    %128 = math.tanh %127 : vector<2x64xf32>
    %129 = arith.mulf %124, %128 : vector<2x64xf32>
    %cst_31 = arith.constant dense<0.000000e+00> : vector<2x256xf32>
    %130 = tpu.matmul %129, %31, %cst_31 {dimension_numbers = #tpu.dot_dimension_numbers<[1], [0], [0], [1], [0, 0, 1, 1], [], []>} : vector<2x64xf32>, vector<64x256xf32>, vector<2x256xf32> -> vector<2x256xf32>
    %131 = vector.extract_strided_slice %130 {offsets = [0, 0], sizes = [2, 128], strides = [1, 1]} : vector<2x256xf32> to vector<2x128xf32>
    %132 = vector.broadcast %34 : vector<1x128xf32> to vector<2x128xf32>
    %133 = arith.addf %132, %131 : vector<2x128xf32>
    %134 = vector.extract_strided_slice %130 {offsets = [0, 128], sizes = [2, 128], strides = [1, 1]} : vector<2x256xf32> to vector<2x128xf32>
    %135 = vector.broadcast %34 : vector<1x128xf32> to vector<2x128xf32>
    %136 = arith.addf %135, %134 : vector<2x128xf32>
    %137 = vector.extract_strided_slice %29 {offsets = [8, 0], sizes = [2, 256], strides = [1, 1]} : vector<16x256xf32> to vector<2x256xf32>
    %cst_32 = arith.constant dense<0.000000e+00> : vector<2x256xf32>
    %138 = tpu.matmul %129, %30, %cst_32 {dimension_numbers = #tpu.dot_dimension_numbers<[1], [0], [0], [1], [0, 0, 1, 1], [], []>} : vector<2x64xf32>, vector<64x256xf32>, vector<2x256xf32> -> vector<2x256xf32>
    %139 = arith.addf %137, %138 : vector<2x256xf32>
    %140 = math.tanh %139 : vector<2x256xf32>
    %141 = vector.broadcast %8 : vector<1x256xf32> to vector<2x256xf32>
    %142 = arith.mulf %140, %141 : vector<2x256xf32>
    %143 = vector.broadcast %11 : vector<1x256xf32> to vector<2x256xf32>
    %144 = arith.addf %142, %143 : vector<2x256xf32>
    %145 = vector.extract_strided_slice %144 {offsets = [0, 0], sizes = [2, 64], strides = [1, 1]} : vector<2x256xf32> to vector<2x64xf32>
    %146 = vector.extract_strided_slice %144 {offsets = [0, 64], sizes = [2, 64], strides = [1, 1]} : vector<2x256xf32> to vector<2x64xf32>
    %147 = vector.extract_strided_slice %144 {offsets = [0, 128], sizes = [2, 64], strides = [1, 1]} : vector<2x256xf32> to vector<2x64xf32>
    %148 = vector.extract_strided_slice %144 {offsets = [0, 192], sizes = [2, 64], strides = [1, 1]} : vector<2x256xf32> to vector<2x64xf32>
    %149 = arith.mulf %146, %127 : vector<2x64xf32>
    %150 = arith.mulf %145, %147 : vector<2x64xf32>
    %151 = arith.addf %149, %150 : vector<2x64xf32>
    %152 = math.tanh %151 : vector<2x64xf32>
    %153 = arith.mulf %148, %152 : vector<2x64xf32>
    %cst_33 = arith.constant dense<0.000000e+00> : vector<2x256xf32>
    %154 = tpu.matmul %153, %31, %cst_33 {dimension_numbers = #tpu.dot_dimension_numbers<[1], [0], [0], [1], [0, 0, 1, 1], [], []>} : vector<2x64xf32>, vector<64x256xf32>, vector<2x256xf32> -> vector<2x256xf32>
    %155 = vector.extract_strided_slice %154 {offsets = [0, 0], sizes = [2, 128], strides = [1, 1]} : vector<2x256xf32> to vector<2x128xf32>
    %156 = arith.addf %136, %155 : vector<2x128xf32>
    %157 = vector.extract_strided_slice %154 {offsets = [0, 128], sizes = [2, 128], strides = [1, 1]} : vector<2x256xf32> to vector<2x128xf32>
    %158 = arith.addf %133, %157 : vector<2x128xf32>
    %159 = vector.extract_strided_slice %29 {offsets = [10, 0], sizes = [2, 256], strides = [1, 1]} : vector<16x256xf32> to vector<2x256xf32>
    %cst_34 = arith.constant dense<0.000000e+00> : vector<2x256xf32>
    %160 = tpu.matmul %153, %30, %cst_34 {dimension_numbers = #tpu.dot_dimension_numbers<[1], [0], [0], [1], [0, 0, 1, 1], [], []>} : vector<2x64xf32>, vector<64x256xf32>, vector<2x256xf32> -> vector<2x256xf32>
    %161 = arith.addf %159, %160 : vector<2x256xf32>
    %162 = math.tanh %161 : vector<2x256xf32>
    %163 = vector.broadcast %8 : vector<1x256xf32> to vector<2x256xf32>
    %164 = arith.mulf %162, %163 : vector<2x256xf32>
    %165 = vector.broadcast %11 : vector<1x256xf32> to vector<2x256xf32>
    %166 = arith.addf %164, %165 : vector<2x256xf32>
    %167 = vector.extract_strided_slice %166 {offsets = [0, 0], sizes = [2, 64], strides = [1, 1]} : vector<2x256xf32> to vector<2x64xf32>
    %168 = vector.extract_strided_slice %166 {offsets = [0, 64], sizes = [2, 64], strides = [1, 1]} : vector<2x256xf32> to vector<2x64xf32>
    %169 = vector.extract_strided_slice %166 {offsets = [0, 128], sizes = [2, 64], strides = [1, 1]} : vector<2x256xf32> to vector<2x64xf32>
    %170 = vector.extract_strided_slice %166 {offsets = [0, 192], sizes = [2, 64], strides = [1, 1]} : vector<2x256xf32> to vector<2x64xf32>
    %171 = arith.mulf %168, %151 : vector<2x64xf32>
    %172 = arith.mulf %167, %169 : vector<2x64xf32>
    %173 = arith.addf %171, %172 : vector<2x64xf32>
    %174 = math.tanh %173 : vector<2x64xf32>
    %175 = arith.mulf %170, %174 : vector<2x64xf32>
    %cst_35 = arith.constant dense<0.000000e+00> : vector<2x256xf32>
    %176 = tpu.matmul %175, %31, %cst_35 {dimension_numbers = #tpu.dot_dimension_numbers<[1], [0], [0], [1], [0, 0, 1, 1], [], []>} : vector<2x64xf32>, vector<64x256xf32>, vector<2x256xf32> -> vector<2x256xf32>
    %177 = vector.extract_strided_slice %176 {offsets = [0, 0], sizes = [2, 128], strides = [1, 1]} : vector<2x256xf32> to vector<2x128xf32>
    %178 = arith.addf %112, %177 : vector<2x128xf32>
    %179 = vector.extract_strided_slice %176 {offsets = [0, 128], sizes = [2, 128], strides = [1, 1]} : vector<2x256xf32> to vector<2x128xf32>
    %180 = arith.addf %109, %179 : vector<2x128xf32>
    %181 = vector.extract_strided_slice %29 {offsets = [12, 0], sizes = [2, 256], strides = [1, 1]} : vector<16x256xf32> to vector<2x256xf32>
    %cst_36 = arith.constant dense<0.000000e+00> : vector<2x256xf32>
    %182 = tpu.matmul %175, %30, %cst_36 {dimension_numbers = #tpu.dot_dimension_numbers<[1], [0], [0], [1], [0, 0, 1, 1], [], []>} : vector<2x64xf32>, vector<64x256xf32>, vector<2x256xf32> -> vector<2x256xf32>
    %183 = arith.addf %181, %182 : vector<2x256xf32>
    %184 = math.tanh %183 : vector<2x256xf32>
    %185 = vector.broadcast %8 : vector<1x256xf32> to vector<2x256xf32>
    %186 = arith.mulf %184, %185 : vector<2x256xf32>
    %187 = vector.broadcast %11 : vector<1x256xf32> to vector<2x256xf32>
    %188 = arith.addf %186, %187 : vector<2x256xf32>
    %189 = vector.extract_strided_slice %188 {offsets = [0, 0], sizes = [2, 64], strides = [1, 1]} : vector<2x256xf32> to vector<2x64xf32>
    %190 = vector.extract_strided_slice %188 {offsets = [0, 64], sizes = [2, 64], strides = [1, 1]} : vector<2x256xf32> to vector<2x64xf32>
    %191 = vector.extract_strided_slice %188 {offsets = [0, 128], sizes = [2, 64], strides = [1, 1]} : vector<2x256xf32> to vector<2x64xf32>
    %192 = vector.extract_strided_slice %188 {offsets = [0, 192], sizes = [2, 64], strides = [1, 1]} : vector<2x256xf32> to vector<2x64xf32>
    %193 = arith.mulf %190, %173 : vector<2x64xf32>
    %194 = arith.mulf %189, %191 : vector<2x64xf32>
    %195 = arith.addf %193, %194 : vector<2x64xf32>
    %196 = math.tanh %195 : vector<2x64xf32>
    %197 = arith.mulf %192, %196 : vector<2x64xf32>
    %cst_37 = arith.constant dense<0.000000e+00> : vector<2x256xf32>
    %198 = tpu.matmul %197, %31, %cst_37 {dimension_numbers = #tpu.dot_dimension_numbers<[1], [0], [0], [1], [0, 0, 1, 1], [], []>} : vector<2x64xf32>, vector<64x256xf32>, vector<2x256xf32> -> vector<2x256xf32>
    %199 = vector.extract_strided_slice %198 {offsets = [0, 0], sizes = [2, 128], strides = [1, 1]} : vector<2x256xf32> to vector<2x128xf32>
    %200 = arith.addf %88, %199 : vector<2x128xf32>
    %201 = vector.extract_strided_slice %198 {offsets = [0, 128], sizes = [2, 128], strides = [1, 1]} : vector<2x256xf32> to vector<2x128xf32>
    %202 = arith.addf %85, %201 : vector<2x128xf32>
    %203 = vector.extract_strided_slice %29 {offsets = [14, 0], sizes = [2, 256], strides = [1, 1]} : vector<16x256xf32> to vector<2x256xf32>
    %cst_38 = arith.constant dense<0.000000e+00> : vector<2x256xf32>
    %204 = tpu.matmul %197, %30, %cst_38 {dimension_numbers = #tpu.dot_dimension_numbers<[1], [0], [0], [1], [0, 0, 1, 1], [], []>} : vector<2x64xf32>, vector<64x256xf32>, vector<2x256xf32> -> vector<2x256xf32>
    %205 = arith.addf %203, %204 : vector<2x256xf32>
    %206 = math.tanh %205 : vector<2x256xf32>
    %207 = vector.broadcast %8 : vector<1x256xf32> to vector<2x256xf32>
    %208 = arith.mulf %206, %207 : vector<2x256xf32>
    %209 = vector.broadcast %11 : vector<1x256xf32> to vector<2x256xf32>
    %210 = arith.addf %208, %209 : vector<2x256xf32>
    %211 = vector.extract_strided_slice %210 {offsets = [0, 0], sizes = [2, 64], strides = [1, 1]} : vector<2x256xf32> to vector<2x64xf32>
    %212 = vector.extract_strided_slice %210 {offsets = [0, 64], sizes = [2, 64], strides = [1, 1]} : vector<2x256xf32> to vector<2x64xf32>
    %213 = vector.extract_strided_slice %210 {offsets = [0, 128], sizes = [2, 64], strides = [1, 1]} : vector<2x256xf32> to vector<2x64xf32>
    %214 = vector.extract_strided_slice %210 {offsets = [0, 192], sizes = [2, 64], strides = [1, 1]} : vector<2x256xf32> to vector<2x64xf32>
    %215 = arith.mulf %212, %195 : vector<2x64xf32>
    %216 = arith.mulf %211, %213 : vector<2x64xf32>
    %217 = arith.addf %215, %216 : vector<2x64xf32>
    %218 = math.tanh %217 : vector<2x64xf32>
    %219 = arith.mulf %214, %218 : vector<2x64xf32>
    %cst_39 = arith.constant dense<0.000000e+00> : vector<2x256xf32>
    %220 = tpu.matmul %219, %31, %cst_39 {dimension_numbers = #tpu.dot_dimension_numbers<[1], [0], [0], [1], [0, 0, 1, 1], [], []>} : vector<2x64xf32>, vector<64x256xf32>, vector<2x256xf32> -> vector<2x256xf32>
    %221 = vector.extract_strided_slice %220 {offsets = [0, 0], sizes = [2, 128], strides = [1, 1]} : vector<2x256xf32> to vector<2x128xf32>
    %222 = arith.addf %61, %221 : vector<2x128xf32>
    %223 = vector.extract_strided_slice %220 {offsets = [0, 128], sizes = [2, 128], strides = [1, 1]} : vector<2x256xf32> to vector<2x128xf32>
    %224 = arith.addf %58, %223 : vector<2x128xf32>
    %225 = vector.extract_strided_slice %219 {offsets = [0, 0], sizes = [2, 32], strides = [1, 1]} : vector<2x64xf32> to vector<2x32xf32>
    %226 = vector.extract_strided_slice %32 {offsets = [0, 0], sizes = [32, 128], strides = [1, 1]} : vector<64x128xf32> to vector<32x128xf32>
    %cst_40 = arith.constant dense<0.000000e+00> : vector<2x128xf32>
    %227 = tpu.matmul %225, %226, %cst_40 {dimension_numbers = #tpu.dot_dimension_numbers<[1], [0], [0], [1], [0, 0, 1, 1], [], []>} : vector<2x32xf32>, vector<32x128xf32>, vector<2x128xf32> -> vector<2x128xf32>
    %c0_41 = arith.constant 0 : index
    %c0_42 = arith.constant 0 : index
    %228 = vector.load %arg5[%c0_41, %c0_42] : memref<32x128xf32, #tpu.memory_space<vmem>>, vector<32x128xf32>
    %cst_43 = arith.constant 0.000000e+00 : f32
    %229 = vector.broadcast %cst_43 : f32 to vector<2x32xf32>
    %cst_44 = arith.constant 0.000000e+00 : f32
    %230 = vector.broadcast %cst_44 : f32 to vector<2x32xf32>
    %cst_45 = arith.constant dense<0.000000e+00> : vector<2x128xf32>
    %231 = tpu.matmul %229, %228, %cst_45 {dimension_numbers = #tpu.dot_dimension_numbers<[1], [0], [0], [1], [0, 0, 1, 1], [], []>} : vector<2x32xf32>, vector<32x128xf32>, vector<2x128xf32> -> vector<2x128xf32>
    %232 = arith.addf %224, %231 : vector<2x128xf32>
    %233 = math.tanh %232 : vector<2x128xf32>
    %234 = vector.broadcast %20 : vector<1x128xf32> to vector<2x128xf32>
    %235 = arith.mulf %233, %234 : vector<2x128xf32>
    %236 = vector.broadcast %23 : vector<1x128xf32> to vector<2x128xf32>
    %237 = arith.addf %235, %236 : vector<2x128xf32>
    %238 = vector.extract_strided_slice %237 {offsets = [0, 0], sizes = [2, 32], strides = [1, 1]} : vector<2x128xf32> to vector<2x32xf32>
    %239 = vector.extract_strided_slice %237 {offsets = [0, 32], sizes = [2, 32], strides = [1, 1]} : vector<2x128xf32> to vector<2x32xf32>
    %240 = vector.extract_strided_slice %237 {offsets = [0, 64], sizes = [2, 32], strides = [1, 1]} : vector<2x128xf32> to vector<2x32xf32>
    %241 = vector.extract_strided_slice %237 {offsets = [0, 96], sizes = [2, 32], strides = [1, 1]} : vector<2x128xf32> to vector<2x32xf32>
    %242 = arith.mulf %239, %230 : vector<2x32xf32>
    %243 = arith.mulf %238, %240 : vector<2x32xf32>
    %244 = arith.addf %242, %243 : vector<2x32xf32>
    %245 = math.tanh %244 : vector<2x32xf32>
    %246 = arith.mulf %241, %245 : vector<2x32xf32>
    %cst_46 = arith.constant dense<0.000000e+00> : vector<2x128xf32>
    %247 = tpu.matmul %246, %228, %cst_46 {dimension_numbers = #tpu.dot_dimension_numbers<[1], [0], [0], [1], [0, 0, 1, 1], [], []>} : vector<2x32xf32>, vector<32x128xf32>, vector<2x128xf32> -> vector<2x128xf32>
    %248 = arith.addf %202, %247 : vector<2x128xf32>
    %249 = math.tanh %248 : vector<2x128xf32>
    %250 = vector.broadcast %20 : vector<1x128xf32> to vector<2x128xf32>
    %251 = arith.mulf %249, %250 : vector<2x128xf32>
    %252 = vector.broadcast %23 : vector<1x128xf32> to vector<2x128xf32>
    %253 = arith.addf %251, %252 : vector<2x128xf32>
    %254 = vector.extract_strided_slice %253 {offsets = [0, 0], sizes = [2, 32], strides = [1, 1]} : vector<2x128xf32> to vector<2x32xf32>
    %255 = vector.extract_strided_slice %253 {offsets = [0, 32], sizes = [2, 32], strides = [1, 1]} : vector<2x128xf32> to vector<2x32xf32>
    %256 = vector.extract_strided_slice %253 {offsets = [0, 64], sizes = [2, 32], strides = [1, 1]} : vector<2x128xf32> to vector<2x32xf32>
    %257 = vector.extract_strided_slice %253 {offsets = [0, 96], sizes = [2, 32], strides = [1, 1]} : vector<2x128xf32> to vector<2x32xf32>
    %258 = arith.mulf %255, %244 : vector<2x32xf32>
    %259 = arith.mulf %254, %256 : vector<2x32xf32>
    %260 = arith.addf %258, %259 : vector<2x32xf32>
    %261 = math.tanh %260 : vector<2x32xf32>
    %262 = arith.mulf %257, %261 : vector<2x32xf32>
    %cst_47 = arith.constant dense<0.000000e+00> : vector<2x128xf32>
    %263 = tpu.matmul %262, %228, %cst_47 {dimension_numbers = #tpu.dot_dimension_numbers<[1], [0], [0], [1], [0, 0, 1, 1], [], []>} : vector<2x32xf32>, vector<32x128xf32>, vector<2x128xf32> -> vector<2x128xf32>
    %264 = arith.addf %180, %263 : vector<2x128xf32>
    %265 = math.tanh %264 : vector<2x128xf32>
    %266 = vector.broadcast %20 : vector<1x128xf32> to vector<2x128xf32>
    %267 = arith.mulf %265, %266 : vector<2x128xf32>
    %268 = vector.broadcast %23 : vector<1x128xf32> to vector<2x128xf32>
    %269 = arith.addf %267, %268 : vector<2x128xf32>
    %270 = vector.extract_strided_slice %269 {offsets = [0, 0], sizes = [2, 32], strides = [1, 1]} : vector<2x128xf32> to vector<2x32xf32>
    %271 = vector.extract_strided_slice %269 {offsets = [0, 32], sizes = [2, 32], strides = [1, 1]} : vector<2x128xf32> to vector<2x32xf32>
    %272 = vector.extract_strided_slice %269 {offsets = [0, 64], sizes = [2, 32], strides = [1, 1]} : vector<2x128xf32> to vector<2x32xf32>
    %273 = vector.extract_strided_slice %269 {offsets = [0, 96], sizes = [2, 32], strides = [1, 1]} : vector<2x128xf32> to vector<2x32xf32>
    %274 = arith.mulf %271, %260 : vector<2x32xf32>
    %275 = arith.mulf %270, %272 : vector<2x32xf32>
    %276 = arith.addf %274, %275 : vector<2x32xf32>
    %277 = math.tanh %276 : vector<2x32xf32>
    %278 = arith.mulf %273, %277 : vector<2x32xf32>
    %cst_48 = arith.constant dense<0.000000e+00> : vector<2x128xf32>
    %279 = tpu.matmul %278, %228, %cst_48 {dimension_numbers = #tpu.dot_dimension_numbers<[1], [0], [0], [1], [0, 0, 1, 1], [], []>} : vector<2x32xf32>, vector<32x128xf32>, vector<2x128xf32> -> vector<2x128xf32>
    %280 = arith.addf %158, %279 : vector<2x128xf32>
    %281 = math.tanh %280 : vector<2x128xf32>
    %282 = vector.broadcast %20 : vector<1x128xf32> to vector<2x128xf32>
    %283 = arith.mulf %281, %282 : vector<2x128xf32>
    %284 = vector.broadcast %23 : vector<1x128xf32> to vector<2x128xf32>
    %285 = arith.addf %283, %284 : vector<2x128xf32>
    %286 = vector.extract_strided_slice %285 {offsets = [0, 0], sizes = [2, 32], strides = [1, 1]} : vector<2x128xf32> to vector<2x32xf32>
    %287 = vector.extract_strided_slice %285 {offsets = [0, 32], sizes = [2, 32], strides = [1, 1]} : vector<2x128xf32> to vector<2x32xf32>
    %288 = vector.extract_strided_slice %285 {offsets = [0, 64], sizes = [2, 32], strides = [1, 1]} : vector<2x128xf32> to vector<2x32xf32>
    %289 = vector.extract_strided_slice %285 {offsets = [0, 96], sizes = [2, 32], strides = [1, 1]} : vector<2x128xf32> to vector<2x32xf32>
    %290 = arith.mulf %287, %276 : vector<2x32xf32>
    %291 = arith.mulf %286, %288 : vector<2x32xf32>
    %292 = arith.addf %290, %291 : vector<2x32xf32>
    %293 = math.tanh %292 : vector<2x32xf32>
    %294 = arith.mulf %289, %293 : vector<2x32xf32>
    %cst_49 = arith.constant dense<0.000000e+00> : vector<2x128xf32>
    %295 = tpu.matmul %294, %228, %cst_49 {dimension_numbers = #tpu.dot_dimension_numbers<[1], [0], [0], [1], [0, 0, 1, 1], [], []>} : vector<2x32xf32>, vector<32x128xf32>, vector<2x128xf32> -> vector<2x128xf32>
    %296 = arith.addf %156, %295 : vector<2x128xf32>
    %297 = math.tanh %296 : vector<2x128xf32>
    %298 = vector.broadcast %20 : vector<1x128xf32> to vector<2x128xf32>
    %299 = arith.mulf %297, %298 : vector<2x128xf32>
    %300 = vector.broadcast %23 : vector<1x128xf32> to vector<2x128xf32>
    %301 = arith.addf %299, %300 : vector<2x128xf32>
    %302 = vector.extract_strided_slice %301 {offsets = [0, 0], sizes = [2, 32], strides = [1, 1]} : vector<2x128xf32> to vector<2x32xf32>
    %303 = vector.extract_strided_slice %301 {offsets = [0, 32], sizes = [2, 32], strides = [1, 1]} : vector<2x128xf32> to vector<2x32xf32>
    %304 = vector.extract_strided_slice %301 {offsets = [0, 64], sizes = [2, 32], strides = [1, 1]} : vector<2x128xf32> to vector<2x32xf32>
    %305 = vector.extract_strided_slice %301 {offsets = [0, 96], sizes = [2, 32], strides = [1, 1]} : vector<2x128xf32> to vector<2x32xf32>
    %306 = arith.mulf %303, %292 : vector<2x32xf32>
    %307 = arith.mulf %302, %304 : vector<2x32xf32>
    %308 = arith.addf %306, %307 : vector<2x32xf32>
    %309 = math.tanh %308 : vector<2x32xf32>
    %310 = arith.mulf %305, %309 : vector<2x32xf32>
    %cst_50 = arith.constant dense<0.000000e+00> : vector<2x128xf32>
    %311 = tpu.matmul %310, %228, %cst_50 {dimension_numbers = #tpu.dot_dimension_numbers<[1], [0], [0], [1], [0, 0, 1, 1], [], []>} : vector<2x32xf32>, vector<32x128xf32>, vector<2x128xf32> -> vector<2x128xf32>
    %312 = arith.addf %178, %311 : vector<2x128xf32>
    %313 = math.tanh %312 : vector<2x128xf32>
    %314 = vector.broadcast %20 : vector<1x128xf32> to vector<2x128xf32>
    %315 = arith.mulf %313, %314 : vector<2x128xf32>
    %316 = vector.broadcast %23 : vector<1x128xf32> to vector<2x128xf32>
    %317 = arith.addf %315, %316 : vector<2x128xf32>
    %318 = vector.extract_strided_slice %317 {offsets = [0, 0], sizes = [2, 32], strides = [1, 1]} : vector<2x128xf32> to vector<2x32xf32>
    %319 = vector.extract_strided_slice %317 {offsets = [0, 32], sizes = [2, 32], strides = [1, 1]} : vector<2x128xf32> to vector<2x32xf32>
    %320 = vector.extract_strided_slice %317 {offsets = [0, 64], sizes = [2, 32], strides = [1, 1]} : vector<2x128xf32> to vector<2x32xf32>
    %321 = vector.extract_strided_slice %317 {offsets = [0, 96], sizes = [2, 32], strides = [1, 1]} : vector<2x128xf32> to vector<2x32xf32>
    %322 = arith.mulf %319, %308 : vector<2x32xf32>
    %323 = arith.mulf %318, %320 : vector<2x32xf32>
    %324 = arith.addf %322, %323 : vector<2x32xf32>
    %325 = math.tanh %324 : vector<2x32xf32>
    %326 = arith.mulf %321, %325 : vector<2x32xf32>
    %cst_51 = arith.constant dense<0.000000e+00> : vector<2x128xf32>
    %327 = tpu.matmul %326, %228, %cst_51 {dimension_numbers = #tpu.dot_dimension_numbers<[1], [0], [0], [1], [0, 0, 1, 1], [], []>} : vector<2x32xf32>, vector<32x128xf32>, vector<2x128xf32> -> vector<2x128xf32>
    %328 = arith.addf %200, %327 : vector<2x128xf32>
    %329 = math.tanh %328 : vector<2x128xf32>
    %330 = vector.broadcast %20 : vector<1x128xf32> to vector<2x128xf32>
    %331 = arith.mulf %329, %330 : vector<2x128xf32>
    %332 = vector.broadcast %23 : vector<1x128xf32> to vector<2x128xf32>
    %333 = arith.addf %331, %332 : vector<2x128xf32>
    %334 = vector.extract_strided_slice %333 {offsets = [0, 0], sizes = [2, 32], strides = [1, 1]} : vector<2x128xf32> to vector<2x32xf32>
    %335 = vector.extract_strided_slice %333 {offsets = [0, 32], sizes = [2, 32], strides = [1, 1]} : vector<2x128xf32> to vector<2x32xf32>
    %336 = vector.extract_strided_slice %333 {offsets = [0, 64], sizes = [2, 32], strides = [1, 1]} : vector<2x128xf32> to vector<2x32xf32>
    %337 = vector.extract_strided_slice %333 {offsets = [0, 96], sizes = [2, 32], strides = [1, 1]} : vector<2x128xf32> to vector<2x32xf32>
    %338 = arith.mulf %335, %324 : vector<2x32xf32>
    %339 = arith.mulf %334, %336 : vector<2x32xf32>
    %340 = arith.addf %338, %339 : vector<2x32xf32>
    %341 = math.tanh %340 : vector<2x32xf32>
    %342 = arith.mulf %337, %341 : vector<2x32xf32>
    %cst_52 = arith.constant dense<0.000000e+00> : vector<2x128xf32>
    %343 = tpu.matmul %342, %228, %cst_52 {dimension_numbers = #tpu.dot_dimension_numbers<[1], [0], [0], [1], [0, 0, 1, 1], [], []>} : vector<2x32xf32>, vector<32x128xf32>, vector<2x128xf32> -> vector<2x128xf32>
    %344 = arith.addf %222, %343 : vector<2x128xf32>
    %345 = math.tanh %344 : vector<2x128xf32>
    %346 = vector.broadcast %20 : vector<1x128xf32> to vector<2x128xf32>
    %347 = arith.mulf %345, %346 : vector<2x128xf32>
    %348 = vector.broadcast %23 : vector<1x128xf32> to vector<2x128xf32>
    %349 = arith.addf %347, %348 : vector<2x128xf32>
    %350 = vector.extract_strided_slice %349 {offsets = [0, 0], sizes = [2, 32], strides = [1, 1]} : vector<2x128xf32> to vector<2x32xf32>
    %351 = vector.extract_strided_slice %349 {offsets = [0, 32], sizes = [2, 32], strides = [1, 1]} : vector<2x128xf32> to vector<2x32xf32>
    %352 = vector.extract_strided_slice %349 {offsets = [0, 64], sizes = [2, 32], strides = [1, 1]} : vector<2x128xf32> to vector<2x32xf32>
    %353 = vector.extract_strided_slice %349 {offsets = [0, 96], sizes = [2, 32], strides = [1, 1]} : vector<2x128xf32> to vector<2x32xf32>
    %354 = arith.mulf %351, %340 : vector<2x32xf32>
    %355 = arith.mulf %350, %352 : vector<2x32xf32>
    %356 = arith.addf %354, %355 : vector<2x32xf32>
    %357 = math.tanh %356 : vector<2x32xf32>
    %358 = arith.mulf %353, %357 : vector<2x32xf32>
    %359 = arith.addf %227, %64 : vector<2x128xf32>
    %360 = vector.broadcast %35 : vector<1x128xf32> to vector<2x128xf32>
    %361 = arith.addf %359, %360 : vector<2x128xf32>
    %362 = math.tanh %361 : vector<2x128xf32>
    %363 = vector.broadcast %20 : vector<1x128xf32> to vector<2x128xf32>
    %364 = arith.mulf %362, %363 : vector<2x128xf32>
    %365 = vector.broadcast %23 : vector<1x128xf32> to vector<2x128xf32>
    %366 = arith.addf %364, %365 : vector<2x128xf32>
    %367 = vector.extract_strided_slice %366 {offsets = [0, 0], sizes = [2, 32], strides = [1, 1]} : vector<2x128xf32> to vector<2x32xf32>
    %368 = vector.extract_strided_slice %366 {offsets = [0, 64], sizes = [2, 32], strides = [1, 1]} : vector<2x128xf32> to vector<2x32xf32>
    %369 = vector.extract_strided_slice %366 {offsets = [0, 96], sizes = [2, 32], strides = [1, 1]} : vector<2x128xf32> to vector<2x32xf32>
    %370 = arith.mulf %367, %368 : vector<2x32xf32>
    %371 = math.tanh %370 : vector<2x32xf32>
    %372 = arith.mulf %369, %371 : vector<2x32xf32>
    %c0_53 = arith.constant 0 : index
    %c0_54 = arith.constant 0 : index
    %373 = vector.load %arg8[%c0_53, %c0_54] : memref<1x64xf32, #tpu.memory_space<vmem>>, vector<1x64xf32>
    %374 = vector.extract_strided_slice %373 {offsets = [0, 0], sizes = [1, 32], strides = [1, 1]} : vector<1x64xf32> to vector<1x32xf32>
    %375 = vector.broadcast %374 : vector<1x32xf32> to vector<2x32xf32>
    %376 = arith.mulf %358, %375 : vector<2x32xf32>
    %cst_55 = arith.constant dense<0.000000e+00> : vector<2xf32>
    %377 = vector.multi_reduction <add>, %376, %cst_55 [1] : vector<2x32xf32> to vector<2xf32>
    %378 = vector.shape_cast %377 : vector<2xf32> to vector<2x1xf32>
    %379 = vector.extract_strided_slice %373 {offsets = [0, 32], sizes = [1, 32], strides = [1, 1]} : vector<1x64xf32> to vector<1x32xf32>
    %380 = vector.broadcast %379 : vector<1x32xf32> to vector<2x32xf32>
    %381 = arith.mulf %372, %380 : vector<2x32xf32>
    %cst_56 = arith.constant dense<0.000000e+00> : vector<2xf32>
    %382 = vector.multi_reduction <add>, %381, %cst_56 [1] : vector<2x32xf32> to vector<2xf32>
    %383 = vector.shape_cast %382 : vector<2xf32> to vector<2x1xf32>
    %384 = arith.addf %378, %383 : vector<2x1xf32>
    %c0_57 = arith.constant 0 : index
    %c0_58 = arith.constant 0 : index
    %385 = vector.load %arg9[%c0_57, %c0_58] : memref<1x1xf32, #tpu.memory_space<vmem>>, vector<1x1xf32>
    %386 = vector.broadcast %385 : vector<1x1xf32> to vector<2x1xf32>
    %387 = arith.addf %384, %386 : vector<2x1xf32>
    %388 = arith.negf %387 : vector<2x1xf32>
    %389 = math.exp %388 : vector<2x1xf32>
    %cst_59 = arith.constant 1.000000e+00 : f32
    %390 = vector.broadcast %cst_59 : f32 to vector<2x1xf32>
    %391 = arith.addf %390, %389 : vector<2x1xf32>
    %392 = arith.divf %390, %391 : vector<2x1xf32>
    %c0_60 = arith.constant 0 : index
    %c0_61 = arith.constant 0 : index
    %393 = vector.load %arg10[%c0_60, %c0_61] : memref<2x1xf32, #tpu.memory_space<vmem>>, vector<2x1xf32>
    tpu.vector_store %arg10[%c0_60, %c0_61], %392 {strides = array<i32>} : memref<2x1xf32, #tpu.memory_space<vmem>>, vector<2x1xf32>,
    return
  }
}

</mosaic_0001>

<bundles_post_ra>
// kernel: net_forward.1
= control target key start
LH: loop header
LB: loop body
LE: loop exit
PB: predicated region body
PF: predicated region fallthrough
CT: control target
= control target key end

     0   :  { %s2556_s0 = inlined_call_operand.vmem [shape: f32[16,12], index: 0, kind: input, shape index: {}]   ;;  %s2557_s1 = inlined_call_operand.vmem [shape: f32[12,256], index: 1, kind: input, shape index: {}]   ;;  %s2558_s2 = inlined_call_operand.vmem [shape: f32[1,256], index: 2, kind: input, shape index: {}]   ;;  %s2559_s3 = inlined_call_operand.hbm [shape: f32[64,256], index: 3, kind: input, shape index: {}]   ;;  %s2560_s4 = inlined_call_operand.hbm [shape: f32[64,256], index: 4, kind: input, shape index: {}]   ;;  %s2561_s5 = inlined_call_operand.hbm [shape: f32[32,128], index: 5, kind: input, shape index: {}]   ;;  %s2562_s6 = inlined_call_operand.vmem [shape: f32[64,128], index: 6, kind: input, shape index: {}]   ;;  %s2563_s7 = inlined_call_operand.vmem [shape: f32[2,128], index: 7, kind: input, shape index: {}]   ;;  %s2564_s8 = inlined_call_operand.vmem [shape: f32[1,64], index: 8, kind: input, shape index: {}]   ;;  %s2565_s9 = inlined_call_operand.<no memory space> [shape: f32[1,1], index: 9, kind: input, shape index: {}]   ;;  %s2566_s10 = inlined_call_operand.vmem [shape: f32[2,1], index: 10, kind: output, shape index: {}]  }
   0x1   :  { %v15_v0 = vstv %s2565_s9 }
   0x2   :  { %16 = vst [vmem:[#allocation2] sm:$0x1] %v15_v0 }
   0x3   :  { %17 = vsyncpa [#allocation4], 0 }
   0x4   :  { %18 = vsyncpa [#allocation6], 0  ;;  %s42_s17 = sshll.u32 %s2560_s4, 4  ;;  %s1830_s18 = smov [#allocation5]   ;;  %s43_s17 = int_to_ptr.hbm [resolvable:$true] %s42_s17 }
   0x5   :  { %s44_s19 = sshll.u32 %s1830_s18, 4  ;;  %s29_s22 = sshll.u32 %s2559_s3, 4  ;;  %s45_s19 = int_to_ptr.vmem [resolvable:$true] %s44_s19  ;;  %s30_s22 = int_to_ptr.hbm [resolvable:$true] %s29_s22 }
   0x6   :  { %s1831_s23 = smov 256   ;;  %s1832_s24 = smov 16  }
   0x7   :  { %50 = dma.hbm_to_vmem [thread:$0]  %s43_s17, 2048, %s45_s19, [#allocation6], %s1831_s23, %s1831_s23, %s1832_s24  }
   0x8   :  { %s1833_s9 = smov [#allocation3]   ;;  %s55_s28 = sshll.u32 %s2561_s5, 4  ;;  %s56_s28 = int_to_ptr.hbm [resolvable:$true] %s55_s28 }
   0x9   :  { %s31_s25 = sshll.u32 %s1833_s9, 4  ;;  %s1834_s4 = smov [#allocation7]   ;;  %s32_s25 = int_to_ptr.vmem [resolvable:$true] %s31_s25 }
   0xa   :  { %37 = dma.hbm_to_vmem [thread:$0]  %s30_s22, 2048, %s32_s25, [#allocation4], %s1831_s23, %s1831_s23, %s1832_s24  }
   0xb   :  { %s57_s29 = sshll.u32 %s1834_s4, 4  ;;  %s1835_s30 = smov 128   ;;  %s58_s29 = int_to_ptr.vmem [resolvable:$true] %s57_s29 }
   0xc   :  { %s1836_s11 = smov 8  }
   0xd   :  { %63 = dma.hbm_to_vmem [thread:$0]  %s56_s28, 512, %s58_s29, [#allocation6], %s1835_s30, %s1835_s30, %s1836_s11  }
   0xe   :  { %1826 = dma.done.wait [#allocation4], 2048  }
   0xf   :  { %1827 = vsyncadd [#allocation4], 4294965248 }
  0x10   :  { %1828 = dma.done.wait [#allocation6], 2560  }
  0x11   :  { %1829 = vsyncadd [#allocation6], 4294964736  ;;  %v1909_v1 = vld [vmem:[#allocation3 + $0x70] sm:$0xff]  ;;  %v1911_v2 = vld [vmem:[#allocation3 + $0x78] sm:$0xff]  ;;  %vm121_vm0 = vcmask 1043456   ;;  %vm114_vm1 = vcmask 97280   ;;  %v84_v23 = vlaneseq }
  0x12   :  { %v1913_v3 = vld [vmem:[#allocation3 + $0x60] sm:$0xff]  ;;  %227 = vmatpush.msra.mxu2 %v1909_v1  ;;  %247 = vmatpush.msra.mxu3 %v1911_v2  ;;  %v1917_v4 = vld [vmem:[#allocation3 + $0x68] sm:$0xff]  ;;  %v1919_v5 = vld [vmem:[#allocation3 + $0x50] sm:$0xff]  ;;  %v1837_v22 = vmov 0.0   ;;  %v1838_v25 = vmov 0.5   ;;  %vm215_vm6 = vcmask 523264  }
  0x13   :  { %v1921_v6 = vld [vmem:[#allocation3 + $0x58] sm:$0xff]  ;;  %v1925_v7 = vld [vmem:[#allocation3 + $0x40] sm:$0xff]  ;;  %v1927_v8 = vld [vmem:[#allocation3 + $0x48] sm:$0xff]  ;;  %v85_v24 = vand.u32 127, %v84_v23  ;;  %s1840_s4 = smov 32   ;;  %vm326_vm7 = vcmask 261120  }
  0x14   :  { %228 = vmatpush.msra.mxu2 %v1913_v3  ;;  %248 = vmatpush.msra.mxu3 %v1917_v4  ;;  %v1931_v9 = vld [vmem:[#allocation3 + $0x30] sm:$0xff]  ;;  %v1939_v12 = vld [vmem:[#allocation3 + $0x38] sm:$0xff]  ;;  %v105_v14 = vld [vmem:[%s2557_s1 + $0x8] sm:$0xff]  ;;  %vm1558_vm8 = vcmask 254976   ;;  %vm1598_vm11 = vcmask 1024  }
  0x15   :  { %v106_v10 = vld [vmem:[%s2557_s1 + $0x10] sm:$0xf]  ;;  %v107_v11 = vld [vmem:[%s2557_s1 + $0x18] sm:$0xf]  ;;  %v104_v13 = vld [vmem:[%s2557_s1] sm:$0xff]  ;;  %vm97_vm2 = vcmp.ge.s32.totalorder %v85_v24, 64 }
  0x16   :  { %229 = vmatpush.msra.mxu2 %v1919_v5  ;;  %249 = vmatpush.msra.mxu3 %v1921_v6  ;;  %v102_v15 = vld [vmem:[%s2556_s0] sm:$0xff]  ;;  %v1954_v17 = vld [vmem:[#allocation3 + $0x28] sm:$0xff]  ;;  %v1958_v18 = vld [vmem:[#allocation3 + $0x10] sm:$0xff]  ;;  %vm98_vm3 = vcmp.lt.s32.totalorder %v85_v24, 96  ;;  %v86_v39 = vadd.s32 128, %v85_v24 }
  0x17   :  { %1606 = vmatpush.msk.msra.mxu0 %vm121_vm0, %v106_v10  ;;  %1609 = vmatpush.msk.msra.mxu1 %vm121_vm0, %v107_v11  ;;  %v1952_v16 = vld [vmem:[#allocation3 + $0x20] sm:$0xff]  ;;  %v1960_v19 = vld [vmem:[#allocation3 + $0x18] sm:$0xff]  ;;  %v1968_v21 = vld [vmem:[#allocation3 + $0x8] sm:$0xff] }
  0x18   :  { %230 = vmatpush.msra.mxu2 %v1925_v7  ;;  %250 = vmatpush.msra.mxu3 %v1927_v8  ;;  %v1966_v20 = vld [vmem:[#allocation3] sm:$0xff]  ;;  %vm99_vm4 = vmand %vm97_vm2, %vm98_vm3  ;;  %vm90_vm5 = vcmp.lt.s32.totalorder %v86_v39, 192  ;;  %v2020_v49 = vld [vmem:[#allocation5 + $0x70] sm:$0xff] }
  0x19   :  { %143 = vmatpush.msra.mxu0 %v104_v13  ;;  %166 = vmatpush.msra.mxu1 %v105_v14  ;;  %v1992_v26 = vsel %vm99_vm4, 1.0, %v1838_v25  ;;  %v1994_v27 = vsel %vm99_vm4, 0.0, %v1838_v25  ;;  %v1999_v28 = vld [vmem:[%s2558_s2] sm:$0x3]  ;;  %v2013_v40 = vsel %vm90_vm5, 1.0, %v1838_v25  ;;  %v2015_v44 = vsel %vm90_vm5, 0.0, %v1838_v25 }
  0x1a   :  { %231 = vmatpush.msra.mxu2 %v1931_v9  ;;  %251 = vmatpush.msra.mxu3 %v1939_v12  ;;  %v110_v29 = vperm.slane %v1999_v28, 0  ;;  %v111_v30 = vperm.slane %v1999_v28, 1  ;;  %s1839_s2 = smov 64   ;;  %v2022_v50 = vld [vmem:[#allocation5 + $0x60] sm:$0xff]  ;;  %v2025_v51 = vld [vmem:[#allocation5 + $0x78] sm:$0xff]  ;;  %v2027_v52 = vld [vmem:[#allocation5 + $0x50] sm:$0xff] }
  0x1b   :  { %1607 = vmatmul.msk.f32.vlgmr.msra.gmra.mxu0 %vm114_vm1, %v102_v15  ;;  %1610 = vmatmul.msk.f32.vlgmr.msra.gmra.mxu1 %vm114_vm1, %v102_v15  ;;  %v2030_v53 = vld [vmem:[#allocation5 + $0x68] sm:$0xff]  ;;  %v2033_v54 = vld [vmem:[#allocation5 + $0x58] sm:$0xff]  ;;  %v2038_v56 = vld [vmem:[#allocation5 + $0x40] sm:$0xff] }
  0x1c   :  { %232 = vmatpush.msra.mxu2 %v1952_v16  ;;  %252 = vmatpush.msra.mxu3 %v1954_v17  ;;  %v103_v55 = vld [vmem:[%s2556_s0 + $0x8] sm:$0xff]  ;;  %v2046_v58 = vld [vmem:[#allocation5 + $0x30] sm:$0xff]  ;;  %v2050_v59 = vld [vmem:[#allocation5 + $0x38] sm:$0xff] }
  0x1d   :  { %289 = vmatpush.msrb.mxu0 %v2020_v49  ;;  %309 = vmatpush.msrb.mxu1 %v2025_v51  ;;  %v2043_v57 = vld [vmem:[#allocation5 + $0x48] sm:$0xff]  ;;  %v2052_v60 = vld [vmem:[#allocation5 + $0x20] sm:$0xff]  ;;  %v2058_v62 = vld [vmem:[#allocation5 + $0x10] sm:$0xff] }
  0x1e   :  { %233 = vmatpush.msra.mxu2 %v1958_v18  ;;  %253 = vmatpush.msra.mxu3 %v1960_v19  ;;  %v2056_v61 = vld [vmem:[#allocation5 + $0x28] sm:$0xff]  ;;  %v2062_v63 = vld [vmem:[#allocation5 + $0x18] sm:$0xff]  ;;  %v2064_v0 = vld [vmem:[#allocation5] sm:$0xff] }
  0x1f   :  { %290 = vmatpush.msrb.mxu0 %v2022_v50  ;;  %310 = vmatpush.msrb.mxu1 %v2030_v53  ;;  %v2068_v10 = vld [vmem:[#allocation5 + $0x8] sm:$0xff] }
  0x20   :  { %234 = vmatpush.msra.mxu2 %v1966_v20  ;;  %254 = vmatpush.msra.mxu3 %v1968_v21 }
  0x21   :  { %235 = vmatmul.f32.vlgmr.msra.gmra.mxu2 %v1837_v22  ;;  %255 = vmatmul.f32.vlgmr.msra.gmra.mxu3 %v1837_v22 }
  0x22   :  { %357 = vmatpush.msrb.mxu3 %v1909_v1  ;;  %291 = vmatpush.msrb.mxu0 %v2027_v52 }
  0x23   :  { %1608 = vmatmul.msk.f32.gmra.mxu0 %vm114_vm1, %v103_v55  ;;  %1611 = vmatmul.msk.f32.gmra.mxu1 %vm114_vm1, %v103_v55 }
  0x24   :  { %358 = vmatpush.msrb.mxu3 %v1913_v3  ;;  %311 = vmatpush.msrb.mxu1 %v2033_v54 }
  0x25   :  { %292 = vmatpush.msrb.mxu0 %v2038_v56 }
  0x26   :  { %359 = vmatpush.msrb.mxu3 %v1919_v5  ;;  %312 = vmatpush.msrb.mxu1 %v2043_v57 }
  0x27   :  { %293 = vmatpush.msrb.mxu0 %v2046_v58 }
  0x28   :  { %360 = vmatpush.msrb.mxu3 %v1925_v7  ;;  %313 = vmatpush.msrb.mxu1 %v2050_v59 }
  0x29   :  { %294 = vmatpush.msrb.mxu0 %v2052_v60 }
  0x2a   :  { %361 = vmatpush.msrb.mxu3 %v1931_v9  ;;  %314 = vmatpush.msrb.mxu1 %v2056_v61 }
  0x2b   :  { %295 = vmatpush.msrb.mxu0 %v2058_v62 }
  0x2c   :  { %362 = vmatpush.msrb.mxu3 %v1952_v16  ;;  %315 = vmatpush.msrb.mxu1 %v2062_v63 }
  0x2d   :  { %296 = vmatpush.msrb.mxu0 %v2064_v0 }
  0x2e   :  { %363 = vmatpush.msrb.mxu3 %v1958_v18  ;;  %316 = vmatpush.msrb.mxu1 %v2068_v10 }
  0x2f   :  { %377 = vmatpush.msra.mxu0 %v1911_v2 }
  0x30   :  { %364 = vmatpush.msrb.mxu3 %v1966_v20  ;;  %429 = vmatpush.msra.mxu1 %v2020_v49 }
  0x31   :  { %378 = vmatpush.msra.mxu0 %v1917_v4 }
  0x32   :  { %471 = vmatpush.msra.mxu3 %v1909_v1  ;;  %430 = vmatpush.msra.mxu1 %v2022_v50 }
  0x33   :  { %379 = vmatpush.msra.mxu0 %v1921_v6 }
  0x34   :  { %472 = vmatpush.msra.mxu3 %v1913_v3  ;;  %431 = vmatpush.msra.mxu1 %v2027_v52 }
  0x35   :  { %380 = vmatpush.msra.mxu0 %v1927_v8 }
  0x36   :  { %473 = vmatpush.msra.mxu3 %v1919_v5  ;;  %432 = vmatpush.msra.mxu1 %v2038_v56 }
  0x37   :  { %381 = vmatpush.msra.mxu0 %v1939_v12 }
  0x38   :  { %474 = vmatpush.msra.mxu3 %v1925_v7  ;;  %433 = vmatpush.msra.mxu1 %v2046_v58 }
  0x39   :  { %382 = vmatpush.msra.mxu0 %v1954_v17 }
  0x3a   :  { %475 = vmatpush.msra.mxu3 %v1931_v9  ;;  %434 = vmatpush.msra.mxu1 %v2052_v60 }
  0x3b   :  { %383 = vmatpush.msra.mxu0 %v1960_v19 }
  0x3c   :  { %476 = vmatpush.msra.mxu3 %v1952_v16  ;;  %435 = vmatpush.msra.mxu1 %v2058_v62 }
  0x3d   :  { %384 = vmatpush.msra.mxu0 %v1968_v21 }
  0x3e   :  { %477 = vmatpush.msra.mxu3 %v1958_v18  ;;  %436 = vmatpush.msra.mxu1 %v2064_v0 }
  0x40   :  { %478 = vmatpush.msra.mxu3 %v1966_v20 }
  0x98   :  { %v145_v31 = vpop.f32.mrf.mxu0  ;;  %v168_v32 = vpop.f32.mrf.mxu1 }
  0x99   :  { %v2005_v33 = vadd.f32 %v145_v31, %v110_v29  ;;  %v2009_v34 = vadd.f32 %v168_v32, %v111_v30 }
  0xa0   :  { %v2132_v25 = vpop.f32.mrf.mxu0 }
  0xa4   :  { %v236_v35 = vpop.f32.mrf.mxu2  ;;  %v256_v36 = vpop.f32.mrf.mxu3 }
  0xa5   :  { %v259_v37 = vadd.f32 %v236_v35, %v2005_v33  ;;  %v260_v38 = vadd.f32 %v256_v36, %v2009_v34 }
  0xa7   :  { %1666 = vtanh.f32 %v259_v37 }
  0xa8   :  { %1668 = vtanh.f32 %v260_v38 }
  0xad   :  { %v1667_v41 = vpop.eup %1666 }
  0xae   :  { %v1669_v42 = vpop.eup %1668  ;;  %v263_v43 = vmul.f32 0.5, %v1667_v41 }
  0xaf   :  { %v264_v45 = vmul.f32 %v1669_v42, %v2013_v40 }
  0xb0   :  { %v265_v46 = vadd.f32 0.5, %v263_v43 }
  0xb1   :  { %v266_v47 = vadd.f32 %v264_v45, %v2015_v44 }
  0xb2   :  { %v267_v11 = vmul.f32 0.0, %v265_v46 }
  0xb3   :  { %v268_v48 = vmul.f32 %v266_v47, %v265_v46 }
  0xb5   :  { %270 = vrot.lane.b32.xlu0 %v268_v48, %s1839_s2 }
 0x127   :  { %v271_v13 = vpop.permute.xlu0 %270 }
 0x128   :  { %v2078_v14 = vadd.f32 %v271_v13, %v267_v11 }
 0x12a   :  { %1670 = vtanh.f32 %v2078_v14  ;;  %v404_v46 = vrot.slane %v2078_v14, 6 }
 0x130   :  { %v1671_v15 = vpop.eup %1670 }
 0x131   :  { %v2090_v23 = vmul.f32 %v1671_v15, %v266_v47 }
 0x133   :  { %277 = vrot.lane.b32.xlu0 %v2090_v23, %s1839_s2 }
 0x1a5   :  { %v278_v24 = vpop.permute.xlu0 %277 }
 0x1a6   :  { %1612 = vmatmul.msk.f32.vlgmr.msrb.gmra.mxu0 %vm215_vm6, %v278_v24  ;;  %1613 = vmatmul.msk.f32.vlgmr.msrb.gmra.mxu1 %vm215_vm6, %v278_v24 }
 0x1a7   :  { %1615 = vmatmul.msk.f32.vlgmr.msrb.gmra.mxu3 %vm215_vm6, %v278_v24  ;;  %491 = vmatpush.msrb.mxu0 %v1911_v2 }
 0x1a8   :  { %543 = vmatpush.msrb.mxu1 %v2020_v49  ;;  %585 = vmatpush.msrb.mxu3 %v1909_v1 }
 0x1a9   :  { %492 = vmatpush.msrb.mxu0 %v1917_v4 }
 0x1aa   :  { %544 = vmatpush.msrb.mxu1 %v2022_v50  ;;  %586 = vmatpush.msrb.mxu3 %v1913_v3 }
 0x1ab   :  { %493 = vmatpush.msrb.mxu0 %v1921_v6 }
 0x1ac   :  { %545 = vmatpush.msrb.mxu1 %v2027_v52  ;;  %587 = vmatpush.msrb.mxu3 %v1919_v5 }
 0x1ad   :  { %494 = vmatpush.msrb.mxu0 %v1927_v8 }
 0x1ae   :  { %1616 = vmatmul.msk.f32.vlgmr.msra.gmra.mxu0 %vm215_vm6, %v278_v24  ;;  %546 = vmatpush.msrb.mxu1 %v2038_v56 }
 0x1af   :  { %495 = vmatpush.msrb.mxu0 %v1939_v12  ;;  %588 = vmatpush.msrb.mxu3 %v1925_v7 }
 0x1b0   :  { %547 = vmatpush.msrb.mxu1 %v2046_v58 }
 0x1b1   :  { %496 = vmatpush.msrb.mxu0 %v1954_v17  ;;  %589 = vmatpush.msrb.mxu3 %v1931_v9 }
 0x1b2   :  { %548 = vmatpush.msrb.mxu1 %v2052_v60 }
 0x1b3   :  { %497 = vmatpush.msrb.mxu0 %v1960_v19  ;;  %590 = vmatpush.msrb.mxu3 %v1952_v16 }
 0x1b4   :  { %549 = vmatpush.msrb.mxu1 %v2058_v62 }
 0x1b5   :  { %498 = vmatpush.msrb.mxu0 %v1968_v21  ;;  %591 = vmatpush.msrb.mxu3 %v1958_v18 }
 0x1b6   :  { %550 = vmatpush.msrb.mxu1 %v2064_v0 }
 0x1b7   :  { %605 = vmatpush.msra.mxu0 %v1911_v2  ;;  %592 = vmatpush.msrb.mxu3 %v1966_v20 }
 0x1b9   :  { %606 = vmatpush.msra.mxu0 %v1917_v4 }
 0x1bb   :  { %607 = vmatpush.msra.mxu0 %v1921_v6 }
 0x1bd   :  { %608 = vmatpush.msra.mxu0 %v1927_v8 }
 0x1bf   :  { %609 = vmatpush.msra.mxu0 %v1939_v12 }
 0x1c1   :  { %610 = vmatpush.msra.mxu0 %v1954_v17 }
 0x1c3   :  { %611 = vmatpush.msra.mxu0 %v1960_v19 }
 0x1c5   :  { %612 = vmatpush.msra.mxu0 %v1968_v21 }
 0x223   :  { %v2134_v31 = vpop.f32.mrf.mxu0 }
 0x22a   :  { %v366_v32 = vpop.f32.mrf.mxu3 }
 0x22b   :  { %v391_v35 = vrot.slane %v366_v32, 6  ;;  %v386_v36 = vpop.f32.mrf.mxu0 }
 0x22c   :  { %v392_v37 = vrot.slane %v386_v36, 6 }
 0x22d   :  { %v395_v38 = vadd.f32 %v391_v35, %v2005_v33 }
 0x22e   :  { %v396_v39 = vadd.f32 %v392_v37, %v2009_v34 }
 0x22f   :  { %1672 = vtanh.f32 %v395_v38 }
 0x230   :  { %1674 = vtanh.f32 %v396_v39 }
 0x235   :  { %v1673_v41 = vpop.eup %1672 }
 0x236   :  { %v1675_v42 = vpop.eup %1674  ;;  %v399_v43 = vmul.f32 0.5, %v1673_v41 }
 0x237   :  { %v400_v45 = vmul.f32 %v1675_v42, %v2013_v40 }
 0x238   :  { %v401_v47 = vadd.f32 0.5, %v399_v43 }
 0x239   :  { %v402_v48 = vadd.f32 %v400_v45, %v2015_v44 }
 0x23a   :  { %v406_v55 = vmul.f32 %v404_v46, %v401_v47 }
 0x23b   :  { %v407_v11 = vmul.f32 %v402_v48, %v401_v47 }
 0x23d   :  { %409 = vrot.lane.b32.xlu1 %v407_v11, %s1839_s2 }
 0x2af   :  { %v410_v13 = vpop.permute.xlu1 %409 }
 0x2b0   :  { %v412_v15 = vadd.f32 %v410_v13, %v406_v55 }
 0x2b2   :  { %1676 = vtanh.f32 %v412_v15 }
 0x2b8   :  { %v1677_v24 = vpop.eup %1676 }
 0x2b9   :  { %v414_v32 = vmul.f32 %v1677_v24, %v402_v48  ;;  %v518_v48 = vrot.slane %v412_v15, 6 }
 0x2bb   :  { %v416_v35 = vrot.slane %v414_v32, 2 }
 0x2bd   :  { %417 = vrot.lane.b32.xlu1 %v416_v35, %s1839_s2 }
 0x32f   :  { %v2143_v36 = vpop.permute.xlu1 %417 }
 0x330   :  { %1617 = vmatmul.msk.f32.vlgmr.msra.gmra.mxu1 %vm215_vm6, %v2143_v36  ;;  %1619 = vmatmul.msk.f32.vlgmr.msra.gmra.mxu3 %vm215_vm6, %v2143_v36 }
 0x331   :  { %1620 = vmatmul.msk.f32.vlgmr.msrb.gmra.mxu0 %vm215_vm6, %v2143_v36  ;;  %657 = vmatpush.msra.mxu1 %v2020_v49 }
 0x332   :  { %699 = vmatpush.msra.mxu3 %v1909_v1  ;;  %719 = vmatpush.msrb.mxu0 %v1911_v2 }
 0x333   :  { %658 = vmatpush.msra.mxu1 %v2022_v50 }
 0x334   :  { %700 = vmatpush.msra.mxu3 %v1913_v3  ;;  %720 = vmatpush.msrb.mxu0 %v1917_v4 }
 0x335   :  { %659 = vmatpush.msra.mxu1 %v2027_v52 }
 0x336   :  { %701 = vmatpush.msra.mxu3 %v1919_v5  ;;  %721 = vmatpush.msrb.mxu0 %v1921_v6 }
 0x337   :  { %660 = vmatpush.msra.mxu1 %v2038_v56 }
 0x338   :  { %702 = vmatpush.msra.mxu3 %v1925_v7  ;;  %722 = vmatpush.msrb.mxu0 %v1927_v8 }
 0x339   :  { %661 = vmatpush.msra.mxu1 %v2046_v58 }
 0x33a   :  { %703 = vmatpush.msra.mxu3 %v1931_v9  ;;  %723 = vmatpush.msrb.mxu0 %v1939_v12 }
 0x33b   :  { %662 = vmatpush.msra.mxu1 %v2052_v60 }
 0x33c   :  { %704 = vmatpush.msra.mxu3 %v1952_v16  ;;  %724 = vmatpush.msrb.mxu0 %v1954_v17 }
 0x33d   :  { %663 = vmatpush.msra.mxu1 %v2058_v62 }
 0x33e   :  { %705 = vmatpush.msra.mxu3 %v1958_v18  ;;  %725 = vmatpush.msrb.mxu0 %v1960_v19 }
 0x33f   :  { %664 = vmatpush.msra.mxu1 %v2064_v0 }
 0x340   :  { %706 = vmatpush.msra.mxu3 %v1966_v20  ;;  %726 = vmatpush.msrb.mxu0 %v1968_v21 }
 0x3ae   :  { %v500_v14 = vpop.f32.mrf.mxu0 }
 0x3af   :  { %v506_v37 = vrot.slane %v500_v14, 4 }
 0x3b1   :  { %v510_v38 = vadd.f32 %v506_v37, %v2009_v34 }
 0x3b3   :  { %v480_v39 = vpop.f32.mrf.mxu3  ;;  %1678 = vtanh.f32 %v510_v38 }
 0x3b4   :  { %v505_v41 = vrot.slane %v480_v39, 4 }
 0x3b6   :  { %v509_v42 = vadd.f32 %v505_v41, %v2005_v33 }
 0x3b8   :  { %1680 = vtanh.f32 %v509_v42 }
 0x3b9   :  { %v1679_v43 = vpop.eup %1678 }
 0x3ba   :  { %v514_v45 = vmul.f32 %v1679_v43, %v2013_v40 }
 0x3bc   :  { %v516_v11 = vadd.f32 %v514_v45, %v2015_v44 }
 0x3be   :  { %v1681_v46 = vpop.eup %1680 }
 0x3bf   :  { %v513_v47 = vmul.f32 0.5, %v1681_v46 }
 0x3c1   :  { %v515_v55 = vadd.f32 0.5, %v513_v47 }
 0x3c3   :  { %v521_v13 = vmul.f32 %v516_v11, %v515_v55  ;;  %v520_v24 = vmul.f32 %v518_v48, %v515_v55 }
 0x3c5   :  { %523 = vrot.lane.b32.xlu2 %v521_v13, %s1839_s2 }
 0x41f   :  { %v524_v32 = vpop.permute.xlu2 %523 }
 0x420   :  { %v526_v35 = vadd.f32 %v524_v32, %v520_v24 }
 0x422   :  { %1682 = vtanh.f32 %v526_v35  ;;  %v632_v13 = vrot.slane %v526_v35, 6  ;;  %v171_v35 = vpop.f32.mrf.mxu1 }
 0x428   :  { %v1683_v14 = vpop.eup %1682 }
 0x429   :  { %v528_v37 = vmul.f32 %v1683_v14, %v516_v11 }
 0x42b   :  { %v530_v38 = vrot.slane %v528_v37, 4 }
 0x42d   :  { %531 = vrot.lane.b32.xlu2 %v530_v38, %s1839_s2 }
 0x487   :  { %v2181_v39 = vpop.permute.xlu2 %531 }
 0x488   :  { %1621 = vmatmul.msk.f32.vlgmr.msrb.gmra.mxu1 %vm215_vm6, %v2181_v39  ;;  %1623 = vmatmul.msk.f32.vlgmr.msrb.gmra.mxu3 %vm215_vm6, %v2181_v39 }
 0x489   :  { %1624 = vmatmul.msk.f32.vlgmr.msra.gmra.mxu0 %vm215_vm6, %v2181_v39  ;;  %764 = vmatpush.msrb.mxu1 %v2020_v49 }
 0x48a   :  { %806 = vmatpush.msrb.mxu3 %v1909_v1  ;;  %826 = vmatpush.msra.mxu0 %v1911_v2 }
 0x48b   :  { %765 = vmatpush.msrb.mxu1 %v2022_v50 }
 0x48c   :  { %807 = vmatpush.msrb.mxu3 %v1913_v3  ;;  %827 = vmatpush.msra.mxu0 %v1917_v4 }
 0x48d   :  { %766 = vmatpush.msrb.mxu1 %v2027_v52 }
 0x48e   :  { %808 = vmatpush.msrb.mxu3 %v1919_v5  ;;  %828 = vmatpush.msra.mxu0 %v1921_v6 }
 0x48f   :  { %767 = vmatpush.msrb.mxu1 %v2038_v56 }
 0x490   :  { %809 = vmatpush.msrb.mxu3 %v1925_v7  ;;  %829 = vmatpush.msra.mxu0 %v1927_v8 }
 0x491   :  { %768 = vmatpush.msrb.mxu1 %v2046_v58 }
 0x492   :  { %810 = vmatpush.msrb.mxu3 %v1931_v9  ;;  %830 = vmatpush.msra.mxu0 %v1939_v12 }
 0x493   :  { %769 = vmatpush.msrb.mxu1 %v2052_v60 }
 0x494   :  { %811 = vmatpush.msrb.mxu3 %v1952_v16  ;;  %831 = vmatpush.msra.mxu0 %v1954_v17 }
 0x495   :  { %770 = vmatpush.msrb.mxu1 %v2058_v62 }
 0x496   :  { %812 = vmatpush.msrb.mxu3 %v1958_v18  ;;  %832 = vmatpush.msra.mxu0 %v1960_v19 }
 0x497   :  { %771 = vmatpush.msrb.mxu1 %v2064_v0 }
 0x498   :  { %813 = vmatpush.msrb.mxu3 %v1966_v20  ;;  %833 = vmatpush.msra.mxu0 %v1968_v21 }
 0x506   :  { %v614_v15 = vpop.f32.mrf.mxu0 }
 0x507   :  { %v620_v41 = vrot.slane %v614_v15, 2 }
 0x509   :  { %v624_v42 = vadd.f32 %v620_v41, %v2009_v34 }
 0x50b   :  { %v594_v43 = vpop.f32.mrf.mxu3  ;;  %1684 = vtanh.f32 %v624_v42 }
 0x50c   :  { %v619_v45 = vrot.slane %v594_v43, 2  ;;  %v2253_v43 = vadd.f32 %v171_v35, %v111_v30  ;;  %v211_v35 = vld [vmem:[%s2562_s6 + $0x28] sm:$0xff] }
 0x50e   :  { %v623_v46 = vadd.f32 %v619_v45, %v2005_v33 }
 0x510   :  { %1686 = vtanh.f32 %v623_v46 }
 0x511   :  { %v1685_v47 = vpop.eup %1684 }
 0x512   :  { %v628_v48 = vmul.f32 %v1685_v47, %v2013_v40  ;;  %v2259_v47 = vadd.f32 %v2132_v25, %v110_v29 }
 0x514   :  { %v630_v32 = vadd.f32 %v628_v48, %v2015_v44 }
 0x516   :  { %v1687_v55 = vpop.eup %1686 }
 0x517   :  { %v627_v11 = vmul.f32 0.5, %v1687_v55 }
 0x519   :  { %v629_v24 = vadd.f32 0.5, %v627_v11 }
 0x51b   :  { %v635_v14 = vmul.f32 %v630_v32, %v629_v24  ;;  %v634_v37 = vmul.f32 %v632_v13, %v629_v24 }
 0x51d   :  { %637 = vrot.lane.b32.xlu0 %v635_v14, %s1839_s2 }
 0x58f   :  { %v638_v34 = vpop.permute.xlu0 %637 }
 0x590   :  { %v640_v38 = vadd.f32 %v638_v34, %v634_v37 }
 0x592   :  { %1688 = vtanh.f32 %v640_v38  ;;  %v740_v30 = vrot.slane %v640_v38, 6  ;;  %v212_v38 = vld [vmem:[%s2562_s6 + $0x30] sm:$0xff] }
 0x598   :  { %v1689_v15 = vpop.eup %1688 }
 0x599   :  { %v642_v41 = vmul.f32 %v1689_v15, %v630_v32 }
 0x59b   :  { %v644_v33 = vrot.slane %v642_v41, 6 }
 0x59d   :  { %645 = vrot.lane.b32.xlu1 %v644_v33, %s1839_s2 }
 0x60f   :  { %v2219_v42 = vpop.permute.xlu1 %645 }
 0x610   :  { %1625 = vmatmul.msk.f32.vlgmr.msra.gmra.mxu1 %vm215_vm6, %v2219_v42  ;;  %1627 = vmatmul.msk.f32.vlgmr.msra.gmra.mxu3 %vm215_vm6, %v2219_v42 }
 0x611   :  { %1628 = vmatmul.msk.f32.vlgmr.msrb.gmra.mxu0 %vm215_vm6, %v2219_v42  ;;  %878 = vmatpush.msra.mxu1 %v2020_v49 }
 0x612   :  { %920 = vmatpush.msra.mxu3 %v1909_v1  ;;  %940 = vmatpush.msrb.mxu0 %v1911_v2 }
 0x613   :  { %879 = vmatpush.msra.mxu1 %v2022_v50 }
 0x614   :  { %921 = vmatpush.msra.mxu3 %v1913_v3  ;;  %941 = vmatpush.msrb.mxu0 %v1917_v4 }
 0x615   :  { %880 = vmatpush.msra.mxu1 %v2027_v52 }
 0x616   :  { %922 = vmatpush.msra.mxu3 %v1919_v5  ;;  %942 = vmatpush.msrb.mxu0 %v1921_v6 }
 0x617   :  { %881 = vmatpush.msra.mxu1 %v2038_v56 }
 0x618   :  { %923 = vmatpush.msra.mxu3 %v1925_v7  ;;  %943 = vmatpush.msrb.mxu0 %v1927_v8 }
 0x619   :  { %882 = vmatpush.msra.mxu1 %v2046_v58 }
 0x61a   :  { %924 = vmatpush.msra.mxu3 %v1931_v9  ;;  %944 = vmatpush.msrb.mxu0 %v1939_v12 }
 0x61b   :  { %883 = vmatpush.msra.mxu1 %v2052_v60 }
 0x61c   :  { %925 = vmatpush.msra.mxu3 %v1952_v16  ;;  %945 = vmatpush.msrb.mxu0 %v1954_v17 }
 0x61d   :  { %884 = vmatpush.msra.mxu1 %v2058_v62 }
 0x61e   :  { %926 = vmatpush.msra.mxu3 %v1958_v18  ;;  %946 = vmatpush.msrb.mxu0 %v1960_v19 }
 0x61f   :  { %885 = vmatpush.msra.mxu1 %v2064_v0 }
 0x620   :  { %927 = vmatpush.msra.mxu3 %v1966_v20  ;;  %947 = vmatpush.msrb.mxu0 %v1968_v21 }
 0x68e   :  { %v728_v45 = vpop.f32.mrf.mxu0 }
 0x68f   :  { %v732_v46 = vadd.f32 %v728_v45, %v2253_v43  ;;  %v210_v45 = vld [vmem:[%s2562_s6 + $0x20] sm:$0xff] }
 0x691   :  { %1690 = vtanh.f32 %v732_v46 }
 0x693   :  { %v708_v48 = vpop.f32.mrf.mxu3 }
 0x694   :  { %v731_v55 = vadd.f32 %v708_v48, %v2259_v47 }
 0x696   :  { %1692 = vtanh.f32 %v731_v55 }
 0x697   :  { %v1691_v11 = vpop.eup %1690 }
 0x698   :  { %v736_v13 = vmul.f32 %v1691_v11, %v2013_v40 }
 0x69a   :  { %v738_v37 = vadd.f32 %v736_v13, %v2015_v44 }
 0x69c   :  { %v1693_v24 = vpop.eup %1692 }
 0x69d   :  { %v735_v32 = vmul.f32 0.5, %v1693_v24 }
 0x69f   :  { %v737_v14 = vadd.f32 0.5, %v735_v32 }
 0x6a1   :  { %v743_v34 = vmul.f32 %v738_v37, %v737_v14  ;;  %v742_v15 = vmul.f32 %v740_v30, %v737_v14 }
 0x6a3   :  { %745 = vrot.lane.b32.xlu2 %v743_v34, %s1839_s2 }
 0x6fd   :  { %v746_v28 = vpop.permute.xlu2 %745 }
 0x6fe   :  { %v748_v29 = vadd.f32 %v746_v28, %v742_v15 }
 0x700   :  { %1694 = vtanh.f32 %v748_v29 }
 0x706   :  { %v1695_v25 = vpop.eup %1694 }
 0x707   :  { %v750_v41 = vmul.f32 %v1695_v25, %v738_v37  ;;  %v2421_v37 = vld [vmem:[%s2563_s7] sm:$0x3] }
 0x708   :  { %v2424_v34 = vperm.slane %v2421_v37, 0 }
 0x709   :  { %752 = vrot.lane.b32.xlu0 %v750_v41, %s1839_s2 }
 0x77b   :  { %v2266_v33 = vpop.permute.xlu0 %752 }
 0x77c   :  { %1629 = vmatmul.msk.f32.vlgmr.msrb.gmra.mxu1 %vm215_vm6, %v2266_v33  ;;  %1631 = vmatmul.msk.f32.vlgmr.msrb.gmra.mxu3 %vm215_vm6, %v2266_v33 }
 0x77d   :  { %1632 = vmatmul.msk.f32.vlgmr.msra.gmra.mxu0 %vm215_vm6, %v2266_v33  ;;  %992 = vmatpush.msrb.mxu1 %v2020_v49 }
 0x77e   :  { %1034 = vmatpush.msrb.mxu3 %v1909_v1  ;;  %1054 = vmatpush.msra.mxu0 %v1911_v2 }
 0x77f   :  { %993 = vmatpush.msrb.mxu1 %v2022_v50 }
 0x780   :  { %1035 = vmatpush.msrb.mxu3 %v1913_v3  ;;  %1055 = vmatpush.msra.mxu0 %v1917_v4 }
 0x781   :  { %994 = vmatpush.msrb.mxu1 %v2027_v52 }
 0x782   :  { %1036 = vmatpush.msrb.mxu3 %v1919_v5  ;;  %1056 = vmatpush.msra.mxu0 %v1921_v6 }
 0x783   :  { %995 = vmatpush.msrb.mxu1 %v2038_v56 }
 0x784   :  { %1037 = vmatpush.msrb.mxu3 %v1925_v7  ;;  %1057 = vmatpush.msra.mxu0 %v1927_v8 }
 0x785   :  { %996 = vmatpush.msrb.mxu1 %v2046_v58 }
 0x786   :  { %1038 = vmatpush.msrb.mxu3 %v1931_v9  ;;  %1058 = vmatpush.msra.mxu0 %v1939_v12 }
 0x787   :  { %997 = vmatpush.msrb.mxu1 %v2052_v60 }
 0x788   :  { %1039 = vmatpush.msrb.mxu3 %v1952_v16  ;;  %1059 = vmatpush.msra.mxu0 %v1954_v17  ;;  %v853_v16 = vrot.slane %v748_v29, 6 }
 0x789   :  { %998 = vmatpush.msrb.mxu1 %v2058_v62 }
 0x78a   :  { %1040 = vmatpush.msrb.mxu3 %v1958_v18  ;;  %1060 = vmatpush.msra.mxu0 %v1960_v19 }
 0x78b   :  { %999 = vmatpush.msrb.mxu1 %v2064_v0 }
 0x78c   :  { %1041 = vmatpush.msrb.mxu3 %v1966_v20  ;;  %1061 = vmatpush.msra.mxu0 %v1968_v21  ;;  %v213_v21 = vld [vmem:[%s2562_s6 + $0x38] sm:$0xff] }
 0x78d   :  { %341 = vmatpush.msrb.mxu2 %v213_v21 }
 0x78f   :  { %342 = vmatpush.msrb.mxu2 %v212_v38 }
 0x791   :  { %343 = vmatpush.msrb.mxu2 %v211_v35 }
 0x793   :  { %344 = vmatpush.msrb.mxu2 %v210_v45 }
 0x795   :  { %449 = vmatpush.msra.mxu2 %v2025_v51 }
 0x797   :  { %450 = vmatpush.msra.mxu2 %v2030_v53 }
 0x799   :  { %451 = vmatpush.msra.mxu2 %v2033_v54 }
 0x79b   :  { %452 = vmatpush.msra.mxu2 %v2043_v57 }
 0x79d   :  { %453 = vmatpush.msra.mxu2 %v2050_v59 }
 0x79f   :  { %454 = vmatpush.msra.mxu2 %v2056_v61 }
 0x7a1   :  { %455 = vmatpush.msra.mxu2 %v2062_v63 }
 0x7a3   :  { %456 = vmatpush.msra.mxu2 %v2068_v10 }
 0x7fa   :  { %v835_v1 = vpop.f32.mrf.mxu0 }
 0x7fb   :  { %v841_v2 = vrot.slane %v835_v1, 6 }
 0x7fd   :  { %v845_v3 = vadd.f32 %v841_v2, %v2253_v43 }
 0x7ff   :  { %v815_v4 = vpop.f32.mrf.mxu3  ;;  %1696 = vtanh.f32 %v845_v3 }
 0x800   :  { %v840_v5 = vrot.slane %v815_v4, 6 }
 0x802   :  { %v844_v6 = vadd.f32 %v840_v5, %v2259_v47 }
 0x804   :  { %1698 = vtanh.f32 %v844_v6 }
 0x805   :  { %v1697_v7 = vpop.eup %1696 }
 0x806   :  { %v849_v8 = vmul.f32 %v1697_v7, %v2013_v40 }
 0x808   :  { %v851_v18 = vadd.f32 %v849_v8, %v2015_v44 }
 0x80a   :  { %v1699_v9 = vpop.eup %1698 }
 0x80b   :  { %v848_v12 = vmul.f32 0.5, %v1699_v9 }
 0x80d   :  { %v850_v17 = vadd.f32 0.5, %v848_v12 }
 0x80f   :  { %v856_v19 = vmul.f32 %v851_v18, %v850_v17  ;;  %v855_v20 = vmul.f32 %v853_v16, %v850_v17 }
 0x811   :  { %858 = vrot.lane.b32.xlu1 %v856_v19, %s1839_s2 }
 0x883   :  { %v859_v46 = vpop.permute.xlu1 %858 }
 0x884   :  { %v2317_v48 = vadd.f32 %v859_v46, %v855_v20  ;;  %v1142_v46 = vld [vmem:[#allocation7 + $0x10] sm:$0xff] }
 0x886   :  { %1700 = vtanh.f32 %v2317_v48 }
 0x88c   :  { %v1701_v55 = vpop.eup %1700 }
 0x88d   :  { %v863_v11 = vmul.f32 %v1701_v55, %v851_v18 }
 0x88f   :  { %v865_v13 = vrot.slane %v863_v11, 2 }
 0x891   :  { %866 = vrot.lane.b32.xlu2 %v865_v13, %s1839_s2  ;;  %v1140_v13 = vld [vmem:[#allocation7] sm:$0xff] }
 0x899   :  { %324 = vrot.lane.b32.xlu2 %v2090_v23, %s1840_s4 }
 0x8eb   :  { %v867_v24 = vpop.permute.xlu2 %866 }
 0x8ec   :  { %1633 = vmatmul.msk.f32.vlgmr.msra.gmra.mxu1 %vm215_vm6, %v867_v24  ;;  %1635 = vmatmul.msk.f32.vlgmr.msra.gmra.mxu3 %vm215_vm6, %v867_v24 }
 0x8ed   :  { %1636 = vmatmul.msk.f32.vlgmr.msrb.gmra.mxu0 %vm215_vm6, %v867_v24  ;;  %1106 = vmatpush.msra.mxu1 %v2020_v49 }
 0x8ef   :  { %1107 = vmatpush.msra.mxu1 %v2022_v50 }
 0x8f1   :  { %1108 = vmatpush.msra.mxu1 %v2027_v52 }
 0x8f3   :  { %v325_v32 = vpop.permute.xlu2 %324  ;;  %1109 = vmatpush.msra.mxu1 %v2038_v56 }
 0x8f4   :  { %1614 = vmatmul.msk.f32.vlgmr.msrb.gmra.mxu2 %vm326_vm7, %v325_v32 }
 0x8f5   :  { %563 = vmatpush.msrb.mxu2 %v2025_v51  ;;  %1110 = vmatpush.msra.mxu1 %v2046_v58 }
 0x8f7   :  { %564 = vmatpush.msrb.mxu2 %v2030_v53  ;;  %1111 = vmatpush.msra.mxu1 %v2052_v60 }
 0x8f9   :  { %565 = vmatpush.msrb.mxu2 %v2033_v54  ;;  %1112 = vmatpush.msra.mxu1 %v2058_v62  ;;  %v967_v62 = vrot.slane %v2317_v48, 6  ;;  %v1141_v48 = vld [vmem:[#allocation7 + $0x8] sm:$0xff] }
 0x8fb   :  { %566 = vmatpush.msrb.mxu2 %v2043_v57  ;;  %1113 = vmatpush.msra.mxu1 %v2064_v0 }
 0x8fc   :  { %1618 = vmatmul.msk.f32.vlgmr.msra.gmra.mxu2 %vm215_vm6, %v2143_v36 }
 0x8fd   :  { %567 = vmatpush.msrb.mxu2 %v2050_v59 }
 0x8ff   :  { %568 = vmatpush.msrb.mxu2 %v2056_v61 }
 0x901   :  { %569 = vmatpush.msrb.mxu2 %v2062_v63 }
 0x903   :  { %570 = vmatpush.msrb.mxu2 %v2068_v10 }
 0x904   :  { %1622 = vmatmul.msk.f32.vlgmr.msrb.gmra.mxu2 %vm215_vm6, %v2181_v39 }
 0x905   :  { %677 = vmatpush.msra.mxu2 %v2025_v51 }
 0x907   :  { %678 = vmatpush.msra.mxu2 %v2030_v53 }
 0x909   :  { %679 = vmatpush.msra.mxu2 %v2033_v54 }
 0x90b   :  { %680 = vmatpush.msra.mxu2 %v2043_v57 }
 0x90d   :  { %681 = vmatpush.msra.mxu2 %v2050_v59 }
 0x90f   :  { %682 = vmatpush.msra.mxu2 %v2056_v61 }
 0x911   :  { %683 = vmatpush.msra.mxu2 %v2062_v63 }
 0x913   :  { %684 = vmatpush.msra.mxu2 %v2068_v10 }
 0x914   :  { %1626 = vmatmul.msk.f32.vlgmr.msra.gmra.mxu2 %vm215_vm6, %v2219_v42 }
 0x915   :  { %784 = vmatpush.msrb.mxu2 %v2025_v51 }
 0x917   :  { %785 = vmatpush.msrb.mxu2 %v2030_v53 }
 0x919   :  { %786 = vmatpush.msrb.mxu2 %v2033_v54 }
 0x91b   :  { %787 = vmatpush.msrb.mxu2 %v2043_v57 }
 0x91d   :  { %788 = vmatpush.msrb.mxu2 %v2050_v59 }
 0x91f   :  { %789 = vmatpush.msrb.mxu2 %v2056_v61 }
 0x921   :  { %790 = vmatpush.msrb.mxu2 %v2062_v63 }
 0x923   :  { %791 = vmatpush.msrb.mxu2 %v2068_v10 }
 0x924   :  { %1630 = vmatmul.msk.f32.vlgmr.msrb.gmra.mxu2 %vm215_vm6, %v2266_v33 }
 0x925   :  { %898 = vmatpush.msra.mxu2 %v2025_v51 }
 0x927   :  { %899 = vmatpush.msra.mxu2 %v2030_v53 }
 0x929   :  { %900 = vmatpush.msra.mxu2 %v2033_v54 }
 0x92b   :  { %901 = vmatpush.msra.mxu2 %v2043_v57 }
 0x92d   :  { %902 = vmatpush.msra.mxu2 %v2050_v59 }
 0x92f   :  { %903 = vmatpush.msra.mxu2 %v2056_v61 }
 0x931   :  { %904 = vmatpush.msra.mxu2 %v2062_v63 }
 0x933   :  { %905 = vmatpush.msra.mxu2 %v2068_v10 }
 0x934   :  { %1634 = vmatmul.msk.f32.vlgmr.msra.gmra.mxu2 %vm215_vm6, %v867_v24 }
 0x935   :  { %1012 = vmatpush.msrb.mxu2 %v2025_v51 }
 0x937   :  { %1013 = vmatpush.msrb.mxu2 %v2030_v53 }
 0x939   :  { %1014 = vmatpush.msrb.mxu2 %v2033_v54 }
 0x93b   :  { %1015 = vmatpush.msrb.mxu2 %v2043_v57 }
 0x93d   :  { %1016 = vmatpush.msrb.mxu2 %v2050_v59 }
 0x93f   :  { %1017 = vmatpush.msrb.mxu2 %v2056_v61 }
 0x941   :  { %1018 = vmatpush.msrb.mxu2 %v2062_v63 }
 0x943   :  { %1019 = vmatpush.msrb.mxu2 %v2068_v10 }
 0x945   :  { %1126 = vmatpush.msra.mxu2 %v2025_v51 }
 0x947   :  { %1127 = vmatpush.msra.mxu2 %v2030_v53 }
 0x949   :  { %1128 = vmatpush.msra.mxu2 %v2033_v54 }
 0x94b   :  { %1129 = vmatpush.msra.mxu2 %v2043_v57  ;;  %v2400_v57 = vpop.f32.mrf.mxu1 }
 0x94d   :  { %1130 = vmatpush.msra.mxu2 %v2050_v59 }
 0x94f   :  { %1131 = vmatpush.msra.mxu2 %v2056_v61 }
 0x951   :  { %1132 = vmatpush.msra.mxu2 %v2062_v63 }
 0x953   :  { %1133 = vmatpush.msra.mxu2 %v2068_v10  ;;  %v2407_v36 = vpop.f32.mrf.mxu1 }
 0x95b   :  { %v2412_v42 = vpop.f32.mrf.mxu1 }
 0x963   :  { %v2416_v14 = vpop.f32.mrf.mxu1 }
 0x96a   :  { %v949_v49 = vpop.f32.mrf.mxu0 }
 0x96b   :  { %v955_v50 = vrot.slane %v949_v49, 4  ;;  %v773_v29 = vpop.f32.mrf.mxu1 }
 0x96d   :  { %v959_v52 = vadd.f32 %v955_v50, %v2253_v43  ;;  %v322_v50 = vadd.f32 %v2424_v34, %v2134_v31 }
 0x96f   :  { %v929_v56 = vpop.f32.mrf.mxu3  ;;  %1702 = vtanh.f32 %v959_v52 }
 0x970   :  { %v954_v51 = vrot.slane %v929_v56, 4 }
 0x972   :  { %v958_v53 = vadd.f32 %v954_v51, %v2259_v47 }
 0x974   :  { %1704 = vtanh.f32 %v958_v53 }
 0x975   :  { %v1703_v54 = vpop.eup %1702 }
 0x976   :  { %v963_v58 = vmul.f32 %v1703_v54, %v2013_v40 }
 0x977   :  { %v2403_v60 = vpop.f32.mrf.mxu2 }
 0x978   :  { %v965_v0 = vadd.f32 %v963_v58, %v2015_v44 }
 0x97a   :  { %v1705_v59 = vpop.eup %1704 }
 0x97b   :  { %v962_v61 = vmul.f32 0.5, %v1705_v59 }
 0x97d   :  { %v964_v63 = vadd.f32 0.5, %v962_v61 }
 0x97f   :  { %v970_v10 = vmul.f32 %v965_v0, %v964_v63  ;;  %v969_v23 = vmul.f32 %v967_v62, %v964_v63  ;;  %v2410_v39 = vpop.f32.mrf.mxu2 }
 0x981   :  { %972 = vrot.lane.b32.xlu0 %v970_v10, %s1839_s2 }
 0x987   :  { %v2414_v30 = vpop.f32.mrf.mxu2 }
 0x997   :  { %v686_v15 = vpop.f32.mrf.mxu2 }
 0x998   :  { %v690_v28 = vadd.f32 %v686_v15, %v2424_v34 }
 0x99a   :  { %v2427_v25 = vadd.f32 %v773_v29, %v690_v28  ;;  %v461_v29 = vadd.f32 %v2407_v36, %v2424_v34 }
 0x9f3   :  { %v973_v41 = vpop.permute.xlu0 %972 }
 0x9f4   :  { %v975_v33 = vadd.f32 %v973_v41, %v969_v23 }
 0x9f6   :  { %1706 = vtanh.f32 %v975_v33  ;;  %v1081_v20 = vrot.slane %v975_v33, 6 }
 0x9fc   :  { %v1707_v1 = vpop.eup %1706 }
 0x9fd   :  { %v977_v2 = vmul.f32 %v1707_v1, %v965_v0 }
 0x9ff   :  { %v979_v3 = vrot.slane %v977_v2, 4 }
 0xa01   :  { %980 = vrot.lane.b32.xlu1 %v979_v3, %s1839_s2 }
 0xa73   :  { %v981_v4 = vpop.permute.xlu1 %980 }
 0xa74   :  { %1637 = vmatmul.msk.f32.vlgmr.msrb.gmra.mxu1 %vm215_vm6, %v981_v4  ;;  %1638 = vmatmul.msk.f32.vlgmr.msrb.gmra.mxu2 %vm215_vm6, %v981_v4 }
 0xa75   :  { %1639 = vmatmul.msk.f32.vlgmr.msrb.gmra.mxu3 %vm215_vm6, %v981_v4  ;;  %1640 = vmatmul.msk.f32.vlgmr.msra.gmra.mxu0 %vm215_vm6, %v981_v4 }
 0xaf2   :  { %v1063_v5 = vpop.f32.mrf.mxu0 }
 0xaf3   :  { %v1069_v6 = vrot.slane %v1063_v5, 2 }
 0xaf5   :  { %v1073_v7 = vadd.f32 %v1069_v6, %v2253_v43  ;;  %v1143_v43 = vld [vmem:[#allocation7 + $0x18] sm:$0xff] }
 0xaf6   :  { %1158 = vmatpush.msra.mxu3 %v1143_v43  ;;  %1204 = vmatpush.msrb.mxu0 %v1143_v43 }
 0xaf7   :  { %1708 = vtanh.f32 %v1073_v7  ;;  %1250 = vmatpush.msrb.mxu1 %v1143_v43  ;;  %1296 = vmatpush.msrb.mxu2 %v1143_v43 }
 0xaf8   :  { %v1043_v8 = vpop.f32.mrf.mxu3  ;;  %1159 = vmatpush.msra.mxu3 %v1142_v46  ;;  %1205 = vmatpush.msrb.mxu0 %v1142_v46 }
 0xaf9   :  { %v1068_v9 = vrot.slane %v1043_v8, 2  ;;  %1251 = vmatpush.msrb.mxu1 %v1142_v46  ;;  %1297 = vmatpush.msrb.mxu2 %v1142_v46 }
 0xafa   :  { %1160 = vmatpush.msra.mxu3 %v1141_v48  ;;  %1206 = vmatpush.msrb.mxu0 %v1141_v48 }
 0xafb   :  { %v1072_v12 = vadd.f32 %v1068_v9, %v2259_v47  ;;  %1252 = vmatpush.msrb.mxu1 %v1141_v48  ;;  %1298 = vmatpush.msrb.mxu2 %v1141_v48 }
 0xafc   :  { %1161 = vmatpush.msra.mxu3 %v1140_v13  ;;  %1207 = vmatpush.msrb.mxu0 %v1140_v13 }
 0xafd   :  { %1710 = vtanh.f32 %v1072_v12  ;;  %v1709_v16 = vpop.eup %1708  ;;  %1162 = vmatmul.f32.vlgmr.msra.gmra.mxu3 %v1837_v22  ;;  %1253 = vmatpush.msrb.mxu1 %v1140_v13  ;;  %v2447_v22 = vpop.f32.mrf.mxu2 }
 0xafe   :  { %v1077_v17 = vmul.f32 %v1709_v16, %v2013_v40  ;;  %1299 = vmatpush.msrb.mxu2 %v1140_v13  ;;  %1342 = vmatpush.msrb.mxu3 %v1143_v43 }
 0xaff   :  { %1388 = vmatpush.msra.mxu0 %v1143_v43 }
 0xb00   :  { %v1079_v38 = vadd.f32 %v1077_v17, %v2015_v44  ;;  %1343 = vmatpush.msrb.mxu3 %v1142_v46 }
 0xb01   :  { %1389 = vmatpush.msra.mxu0 %v1142_v46 }
 0xb02   :  { %1344 = vmatpush.msrb.mxu3 %v1141_v48 }
 0xb03   :  { %v1711_v18 = vpop.eup %1710  ;;  %1390 = vmatpush.msra.mxu0 %v1141_v48 }
 0xb04   :  { %v1076_v19 = vmul.f32 0.5, %v1711_v18  ;;  %1345 = vmatpush.msrb.mxu3 %v1140_v13  ;;  %v2467_v18 = vpop.f32.mrf.mxu1 }
 0xb05   :  { %1391 = vmatpush.msra.mxu0 %v1140_v13  ;;  %v907_v32 = vpop.f32.mrf.mxu2 }
 0xb06   :  { %v1078_v21 = vadd.f32 0.5, %v1076_v19 }
 0xb08   :  { %v1084_v35 = vmul.f32 %v1079_v38, %v1078_v21  ;;  %v1083_v45 = vmul.f32 %v1081_v20, %v1078_v21  ;;  %v575_v21 = vadd.f32 %v2412_v42, %v2424_v34 }
 0xb0a   :  { %1086 = vrot.lane.b32.xlu0 %v1084_v35, %s1839_s2 }
 0xb0c   :  { %v2469_v19 = vpop.f32.mrf.mxu1 }
 0xb0d   :  { %v1021_v49 = vpop.f32.mrf.mxu2 }
 0xb0e   :  { %v1025_v41 = vadd.f32 %v1021_v49, %v461_v29 }
 0xb7c   :  { %v1087_v40 = vpop.permute.xlu0 %1086 }
 0xb7d   :  { %v1089_v44 = vadd.f32 %v1087_v40, %v1083_v45 }
 0xb7f   :  { %1712 = vtanh.f32 %v1089_v44 }
 0xb80   :  { %v1163_v56 = vpop.f32.mrf.mxu3 }
 0xb85   :  { %v1713_v47 = vpop.eup %1712 }
 0xb86   :  { %v1091_v55 = vmul.f32 %v1713_v47, %v1079_v38  ;;  %v911_v38 = vadd.f32 %v907_v32, %v575_v21 }
 0xb88   :  { %v1093_v11 = vrot.slane %v1091_v55, 6 }
 0xb8a   :  { %1094 = vrot.lane.b32.xlu1 %v1093_v11, %s1839_s2 }
 0xbfc   :  { %v2441_v24 = vpop.permute.xlu1 %1094 }
 0xbfd   :  { %1641 = vmatmul.msk.f32.vlgmr.msra.gmra.mxu1 %vm215_vm6, %v2441_v24  ;;  %1642 = vmatmul.msk.f32.vlgmr.msra.gmra.mxu2 %vm215_vm6, %v2441_v24 }
 0xbfe   :  { %1434 = vmatpush.msra.mxu1 %v1143_v43  ;;  %1480 = vmatpush.msra.mxu2 %v1143_v43 }
 0xc00   :  { %1435 = vmatpush.msra.mxu1 %v1142_v46  ;;  %1481 = vmatpush.msra.mxu2 %v1142_v46 }
 0xc02   :  { %1436 = vmatpush.msra.mxu1 %v1141_v48  ;;  %1482 = vmatpush.msra.mxu2 %v1141_v48 }
 0xc04   :  { %1437 = vmatpush.msra.mxu1 %v1140_v13  ;;  %1483 = vmatpush.msra.mxu2 %v1140_v13 }
 0xc7a   :  { %v2471_v20 = vpop.f32.mrf.mxu1 }
 0xc80   :  { %v1135_v52 = vpop.f32.mrf.mxu2 }
 0xc81   :  { %v1139_v51 = vadd.f32 %v1135_v52, %v322_v50  ;;  %v689_v50 = vadd.f32 %v2416_v14, %v2424_v34 }
 0xc83   :  { %v1166_v53 = vadd.f32 %v1163_v56, %v1139_v51  ;;  %v797_v52 = vadd.f32 %v2447_v22, %v689_v50 }
 0xc85   :  { %1714 = vtanh.f32 %v1166_v53 }
 0xc8b   :  { %v1715_v54 = vpop.eup %1714 }
 0xc8c   :  { %v1168_v58 = vmul.f32 %v1715_v54, %v1992_v26 }
 0xc8e   :  { %v1169_v59 = vadd.f32 %v1168_v58, %v1994_v27 }
 0xc90   :  { %1172 = vrot.lane.b32.xlu2 %v1169_v59, %s1839_s2  ;;  %v1170_v63 = vmul.f32 0.0, %v1169_v59 }
 0xcea   :  { %v1173_v61 = vpop.permute.xlu2 %1172 }
 0xceb   :  { %v1175_v62 = vmul.f32 %v1173_v61, %v1169_v59 }
 0xced   :  { %1177 = vrot.lane.b32.xlu0 %v1175_v62, %s1840_s4 }
 0xd5f   :  { %v1178_v0 = vpop.permute.xlu0 %1177 }
 0xd60   :  { %v1180_v10 = vadd.f32 %v1178_v0, %v1170_v63 }
 0xd62   :  { %1716 = vtanh.f32 %v1180_v10 }
 0xd68   :  { %v1717_v31 = vpop.eup %1716 }
 0xd69   :  { %1183 = vrot.lane.b32.xlu1 %v1717_v31, %s1839_s2  ;;  %v209_v31 = vld [vmem:[%s2562_s6 + $0x18] sm:$0xff] }
 0xd6a   :  { %1523 = vmatpush.msra.mxu3 %v209_v31 }
 0xddb   :  { %v1184_v23 = vpop.permute.xlu1 %1183 }
 0xddc   :  { %v1186_v15 = vmul.f32 %v1184_v23, %v1169_v59  ;;  %v208_v23 = vld [vmem:[%s2562_s6 + $0x10] sm:$0xff] }
 0xddd   :  { %1524 = vmatpush.msra.mxu3 %v208_v23 }
 0xdde   :  { %1188 = vrot.lane.b32.xlu2 %v1186_v15, %s1840_s4  ;;  %v207_v15 = vld [vmem:[%s2562_s6 + $0x8] sm:$0xff] }
 0xddf   :  { %1525 = vmatpush.msra.mxu3 %v207_v15 }
 0xe38   :  { %v1189_v28 = vpop.permute.xlu2 %1188 }
 0xe39   :  { %1643 = vmatmul.msk.f32.vlgmr.msrb.gmra.mxu0 %vm326_vm7, %v1189_v28  ;;  %v206_v28 = vld [vmem:[%s2562_s6] sm:$0xff]  ;;  %s1841_s6 = smov 96  }
 0xe3a   :  { %1526 = vmatpush.msra.mxu3 %v206_v28 }
 0xeb6   :  { %v1209_v33 = vpop.f32.mrf.mxu0 }
 0xeb7   :  { %v1212_v1 = vadd.f32 %v1209_v33, %v1025_v41 }
 0xeb9   :  { %1718 = vtanh.f32 %v1212_v1 }
 0xebf   :  { %v1719_v2 = vpop.eup %1718 }
 0xec0   :  { %v1214_v3 = vmul.f32 %v1719_v2, %v1992_v26 }
 0xec2   :  { %v1215_v4 = vadd.f32 %v1214_v3, %v1994_v27 }
 0xec4   :  { %1218 = vrot.lane.b32.xlu0 %v1215_v4, %s1839_s2  ;;  %v1216_v7 = vmul.f32 %v1215_v4, %v1180_v10 }
 0xf36   :  { %v1219_v5 = vpop.permute.xlu0 %1218 }
 0xf37   :  { %v1221_v6 = vmul.f32 %v1219_v5, %v1215_v4 }
 0xf39   :  { %1223 = vrot.lane.b32.xlu1 %v1221_v6, %s1840_s4 }
 0xfab   :  { %v1224_v8 = vpop.permute.xlu1 %1223 }
 0xfac   :  { %v1226_v9 = vadd.f32 %v1224_v8, %v1216_v7 }
 0xfae   :  { %1720 = vtanh.f32 %v1226_v9 }
 0xfb4   :  { %v1721_v36 = vpop.eup %1720 }
 0xfb5   :  { %1229 = vrot.lane.b32.xlu2 %v1721_v36, %s1839_s2 }
0x100f   :  { %v1230_v12 = vpop.permute.xlu2 %1229 }
0x1010   :  { %v1232_v16 = vmul.f32 %v1230_v12, %v1215_v4  ;;  %v576_v12 = vadd.f32 %v2414_v30, %v2424_v34 }
0x1012   :  { %1234 = vrot.lane.b32.xlu0 %v1232_v16, %s1840_s4  ;;  %v910_v16 = vadd.f32 %v2467_v18, %v576_v12 }
0x1084   :  { %v1235_v17 = vpop.permute.xlu0 %1234 }
0x1085   :  { %1644 = vmatmul.msk.f32.vlgmr.msrb.gmra.mxu1 %vm326_vm7, %v1235_v17 }
0x1102   :  { %v1255_v35 = vpop.f32.mrf.mxu1 }
0x1103   :  { %v1258_v45 = vadd.f32 %v1255_v35, %v911_v38 }
0x1105   :  { %1722 = vtanh.f32 %v1258_v45 }
0x110b   :  { %v1723_v43 = vpop.eup %1722 }
0x110c   :  { %v1260_v46 = vmul.f32 %v1723_v43, %v1992_v26 }
0x110e   :  { %v1261_v48 = vadd.f32 %v1260_v46, %v1994_v27 }
0x1110   :  { %1264 = vrot.lane.b32.xlu1 %v1261_v48, %s1839_s2  ;;  %v1262_v47 = vmul.f32 %v1261_v48, %v1226_v9 }
0x1182   :  { %v1265_v40 = vpop.permute.xlu1 %1264 }
0x1183   :  { %v1267_v44 = vmul.f32 %v1265_v40, %v1261_v48 }
0x1185   :  { %1269 = vrot.lane.b32.xlu2 %v1267_v44, %s1840_s4 }
0x11df   :  { %v1270_v55 = vpop.permute.xlu2 %1269 }
0x11e0   :  { %v1272_v11 = vadd.f32 %v1270_v55, %v1262_v47 }
0x11e2   :  { %1724 = vtanh.f32 %v1272_v11 }
0x11e8   :  { %v1725_v42 = vpop.eup %1724 }
0x11e9   :  { %1275 = vrot.lane.b32.xlu0 %v1725_v42, %s1839_s2 }
0x125b   :  { %v1276_v13 = vpop.permute.xlu0 %1275 }
0x125c   :  { %v1278_v32 = vmul.f32 %v1276_v13, %v1261_v48 }
0x125e   :  { %1280 = vrot.lane.b32.xlu1 %v1278_v32, %s1840_s4 }
0x12d0   :  { %v1281_v49 = vpop.permute.xlu1 %1280 }
0x12d1   :  { %1645 = vmatmul.msk.f32.vlgmr.msrb.gmra.mxu2 %vm326_vm7, %v1281_v49 }
0x1354   :  { %v1301_v56 = vpop.f32.mrf.mxu2 }
0x1355   :  { %v1304_v51 = vadd.f32 %v1301_v56, %v797_v52 }
0x1357   :  { %1726 = vtanh.f32 %v1304_v51 }
0x135d   :  { %v1727_v53 = vpop.eup %1726 }
0x135e   :  { %v1306_v54 = vmul.f32 %v1727_v53, %v1992_v26 }
0x1360   :  { %v1307_v58 = vadd.f32 %v1306_v54, %v1994_v27 }
0x1362   :  { %1310 = vrot.lane.b32.xlu2 %v1307_v58, %s1839_s2  ;;  %v1308_v62 = vmul.f32 %v1307_v58, %v1272_v11  ;;  %v462_v11 = vadd.f32 %v2410_v39, %v2424_v34 }
0x1364   :  { %v1024_v42 = vadd.f32 %v2469_v19, %v462_v11 }
0x13bc   :  { %v1311_v59 = vpop.permute.xlu2 %1310 }
0x13bd   :  { %v1313_v61 = vmul.f32 %v1311_v59, %v1307_v58 }
0x13bf   :  { %1315 = vrot.lane.b32.xlu0 %v1313_v61, %s1840_s4  ;;  %v1531_v61 = vperm.slane %v2421_v37, 1 }
0x1431   :  { %v1316_v63 = vpop.permute.xlu0 %1315 }
0x1432   :  { %v1318_v0 = vadd.f32 %v1316_v63, %v1308_v62 }
0x1434   :  { %1728 = vtanh.f32 %v1318_v0 }
0x143a   :  { %v1729_v14 = vpop.eup %1728 }
0x143b   :  { %1321 = vrot.lane.b32.xlu1 %v1729_v14, %s1839_s2 }
0x14ad   :  { %v1322_v22 = vpop.permute.xlu1 %1321 }
0x14ae   :  { %v1324_v10 = vmul.f32 %v1322_v22, %v1307_v58 }
0x14b0   :  { %1326 = vrot.lane.b32.xlu2 %v1324_v10, %s1840_s4 }
0x150a   :  { %v1327_v29 = vpop.permute.xlu2 %1326 }
0x150b   :  { %1646 = vmatmul.msk.f32.vlgmr.msrb.gmra.mxu3 %vm326_vm7, %v1327_v29 }
0x1513   :  { %1650 = vmatmul.msk.f32.vlgmr.msra.gmra.mxu3 %vm326_vm7, %v2441_v24 }
0x158e   :  { %v1347_v41 = vpop.f32.mrf.mxu3 }
0x158f   :  { %v1350_v33 = vadd.f32 %v1347_v41, %v2427_v25 }
0x1591   :  { %1730 = vtanh.f32 %v1350_v33 }
0x1596   :  { %v1528_v19 = vpop.f32.mrf.mxu3 }
0x1597   :  { %v1731_v1 = vpop.eup %1730  ;;  %v1529_v59 = vadd.f32 %v1528_v19, %v2403_v60  ;;  %v323_v60 = vadd.f32 %v2424_v34, %v2400_v57  ;;  %v1664_v34 = vld [vmem:[%s2564_s8] ss:$0 sm:$0xff] }
0x1598   :  { %v1352_v2 = vmul.f32 %v1731_v1, %v1992_v26 }
0x1599   :  { %v1532_v62 = vadd.f32 %v1531_v61, %v1529_v59  ;;  %v1138_v37 = vadd.f32 %v2471_v20, %v323_v60 }
0x159a   :  { %v1353_v3 = vadd.f32 %v1352_v2, %v1994_v27 }
0x159c   :  { %1356 = vrot.lane.b32.xlu0 %v1353_v3, %s1839_s2  ;;  %v1354_v6 = vmul.f32 %v1353_v3, %v1318_v0 }
0x160e   :  { %v1357_v4 = vpop.permute.xlu0 %1356 }
0x160f   :  { %v1359_v5 = vmul.f32 %v1357_v4, %v1353_v3 }
0x1611   :  { %1361 = vrot.lane.b32.xlu1 %v1359_v5, %s1840_s4 }
0x1683   :  { %v1362_v7 = vpop.permute.xlu1 %1361 }
0x1684   :  { %v1364_v8 = vadd.f32 %v1362_v7, %v1354_v6 }
0x1686   :  { %1732 = vtanh.f32 %v1364_v8 }
0x168c   :  { %v1733_v24 = vpop.eup %1732 }
0x168d   :  { %1367 = vrot.lane.b32.xlu2 %v1733_v24, %s1839_s2 }
0x16e7   :  { %v1368_v25 = vpop.permute.xlu2 %1367 }
0x16e8   :  { %v1370_v9 = vmul.f32 %v1368_v25, %v1353_v3 }
0x16ea   :  { %1372 = vrot.lane.b32.xlu0 %v1370_v9, %s1840_s4 }
0x175c   :  { %v1373_v36 = vpop.permute.xlu0 %1372 }
0x175d   :  { %1647 = vmatmul.msk.f32.vlgmr.msra.gmra.mxu0 %vm326_vm7, %v1373_v36 }
0x17da   :  { %v1393_v17 = vpop.f32.mrf.mxu0 }
0x17db   :  { %v1396_v21 = vadd.f32 %v1393_v17, %v910_v16 }
0x17dd   :  { %1734 = vtanh.f32 %v1396_v21 }
0x17e3   :  { %v1735_v38 = vpop.eup %1734 }
0x17e4   :  { %v1398_v35 = vmul.f32 %v1735_v38, %v1992_v26  ;;  %v1665_v38 = vld [vmem:[#allocation2] ss:$0 sm:$0xff] }
0x17e6   :  { %v1399_v45 = vadd.f32 %v1398_v35, %v1994_v27 }
0x17e8   :  { %1402 = vrot.lane.b32.xlu1 %v1399_v45, %s1839_s2  ;;  %v1400_v48 = vmul.f32 %v1399_v45, %v1364_v8 }
0x185a   :  { %v1403_v43 = vpop.permute.xlu1 %1402 }
0x185b   :  { %v1405_v46 = vmul.f32 %v1403_v43, %v1399_v45 }
0x185d   :  { %1407 = vrot.lane.b32.xlu2 %v1405_v46, %s1840_s4 }
0x18b7   :  { %v1408_v40 = vpop.permute.xlu2 %1407 }
0x18b8   :  { %v1410_v44 = vadd.f32 %v1408_v40, %v1400_v48 }
0x18ba   :  { %1736 = vtanh.f32 %v1410_v44 }
0x18c0   :  { %v1737_v30 = vpop.eup %1736 }
0x18c1   :  { %1413 = vrot.lane.b32.xlu0 %v1737_v30, %s1839_s2 }
0x1933   :  { %v1414_v18 = vpop.permute.xlu0 %1413 }
0x1934   :  { %v1416_v47 = vmul.f32 %v1414_v18, %v1399_v45 }
0x1936   :  { %1418 = vrot.lane.b32.xlu1 %v1416_v47, %s1840_s4 }
0x19a8   :  { %v1419_v55 = vpop.permute.xlu1 %1418 }
0x19a9   :  { %1648 = vmatmul.msk.f32.vlgmr.msra.gmra.mxu1 %vm326_vm7, %v1419_v55 }
0x1a26   :  { %v1439_v13 = vpop.f32.mrf.mxu1 }
0x1a27   :  { %v1442_v32 = vadd.f32 %v1439_v13, %v1024_v42 }
0x1a29   :  { %1738 = vtanh.f32 %v1442_v32 }
0x1a2f   :  { %v1739_v49 = vpop.eup %1738 }
0x1a30   :  { %v1444_v50 = vmul.f32 %v1739_v49, %v1992_v26 }
0x1a32   :  { %v1445_v52 = vadd.f32 %v1444_v50, %v1994_v27 }
0x1a34   :  { %1448 = vrot.lane.b32.xlu2 %v1445_v52, %s1839_s2  ;;  %v1446_v53 = vmul.f32 %v1445_v52, %v1410_v44 }
0x1a8e   :  { %v1449_v56 = vpop.permute.xlu2 %1448 }
0x1a8f   :  { %v1451_v51 = vmul.f32 %v1449_v56, %v1445_v52 }
0x1a91   :  { %1453 = vrot.lane.b32.xlu0 %v1451_v51, %s1840_s4 }
0x1b03   :  { %v1454_v54 = vpop.permute.xlu0 %1453 }
0x1b04   :  { %v1456_v58 = vadd.f32 %v1454_v54, %v1446_v53 }
0x1b06   :  { %1740 = vtanh.f32 %v1456_v58 }
0x1b07   :  { %1742 = vtanh.f32 %v1532_v62 }
0x1b0c   :  { %v1741_v39 = vpop.eup %1740 }
0x1b0d   :  { %1459 = vrot.lane.b32.xlu1 %v1741_v39, %s1839_s2  ;;  %v1743_v14 = vpop.eup %1742 }
0x1b0e   :  { %v1534_v22 = vmul.f32 %v1743_v14, %v1992_v26 }
0x1b10   :  { %v1535_v10 = vadd.f32 %v1534_v22, %v1994_v27 }
0x1b7f   :  { %v1460_v63 = vpop.permute.xlu1 %1459 }
0x1b80   :  { %v1462_v0 = vmul.f32 %v1460_v63, %v1445_v52 }
0x1b82   :  { %1464 = vrot.lane.b32.xlu2 %v1462_v0, %s1840_s4 }
0x1b8a   :  { %1537 = vrot.lane.b32.xlu2 %v1535_v10, %s1839_s2 }
0x1b92   :  { %1550 = vrot.lane.b32.xlu2 %v1664_v34, %s1841_s6 }
0x1bdc   :  { %v1465_v31 = vpop.permute.xlu2 %1464 }
0x1bdd   :  { %1649 = vmatmul.msk.f32.vlgmr.msra.gmra.mxu2 %vm326_vm7, %v1465_v31 }
0x1be4   :  { %v1538_v33 = vpop.permute.xlu2 %1537 }
0x1be5   :  { %v1540_v1 = vmul.f32 %v1538_v33, %v1535_v10 }
0x1bec   :  { %v1551_v6 = vpop.permute.xlu2 %1550 }
0x1c60   :  { %v1485_v23 = vpop.f32.mrf.mxu2 }
0x1c61   :  { %v1488_v15 = vadd.f32 %v1485_v23, %v1138_v37 }
0x1c63   :  { %1744 = vtanh.f32 %v1488_v15 }
0x1c64   :  { %1746 = vtanh.f32 %v1540_v1 }
0x1c69   :  { %v1745_v28 = vpop.eup %1744 }
0x1c6a   :  { %v1490_v29 = vmul.f32 %v1745_v28, %v1992_v26  ;;  %v1747_v57 = vpop.eup %1746 }
0x1c6c   :  { %v1491_v41 = vadd.f32 %v1490_v29, %v1994_v27 }
0x1c6e   :  { %1494 = vrot.lane.b32.xlu0 %v1491_v41, %s1839_s2  ;;  %v1492_v26 = vmul.f32 %v1491_v41, %v1456_v58 }
0x1ce0   :  { %v1495_v2 = vpop.permute.xlu0 %1494 }
0x1ce1   :  { %v1497_v3 = vmul.f32 %v1495_v2, %v1491_v41 }
0x1ce3   :  { %1499 = vrot.lane.b32.xlu1 %v1497_v3, %s1840_s4 }
0x1ceb   :  { %1543 = vrot.lane.b32.xlu1 %v1747_v57, %s1841_s6 }
0x1d55   :  { %v1500_v20 = vpop.permute.xlu1 %1499 }
0x1d56   :  { %v1502_v27 = vadd.f32 %v1500_v20, %v1492_v26 }
0x1d58   :  { %1748 = vtanh.f32 %v1502_v27 }
0x1d5d   :  { %v1544_v24 = vpop.permute.xlu1 %1543 }
0x1d5e   :  { %v1749_v4 = vpop.eup %1748  ;;  %v1546_v25 = vmul.f32 %v1544_v24, %v1535_v10 }
0x1d5f   :  { %1505 = vrot.lane.b32.xlu0 %v1749_v4, %s1839_s2 }
0x1d67   :  { %1562 = vrot.lane.b32.xlu0 %v1664_v34, %s1839_s2 }
0x1dd1   :  { %v1506_v5 = vpop.permute.xlu0 %1505 }
0x1dd2   :  { %v1508_v7 = vmul.f32 %v1506_v5, %v1491_v41 }
0x1dd4   :  { %v1553_v8 = vmul.f32 %v1551_v6, %v1508_v7 }
0x1dd6   :  { %1555 = vrot.lane.b32.xlu1 %v1553_v8, %s1840_s4 }
0x1dd9   :  { %v1563_v9 = vpop.permute.xlu0 %1562 }
0x1dda   :  { %v1565_v36 = vmul.f32 %v1563_v9, %v1546_v25 }
0x1ddc   :  { %1567 = vrot.lane.b32.xlu2 %v1565_v36, %s1840_s4 }
0x1e36   :  { %v1568_v12 = vpop.permute.xlu2 %1567 }
0x1e37   :  { %v1570_v16 = vsel %vm1558_vm8, %v1568_v12, 0.0 }
0x1e38   :  { %1571 = vadd.xlane.f32.xlu1 %v1570_v16 }
0x1e48   :  { %v1556_v17 = vpop.permute.xlu1 %1555 }
0x1e49   :  { %v1559_v21 = vsel %vm1558_vm8, %v1556_v17, 0.0 }
0x1e4a   :  { %1560 = vadd.xlane.f32.xlu0 %v1559_v21 }
0x1eab   :  { %v1572_v35 = vpop.xlane.xlu1 %1571 }
0x1ebd   :  { %v1561_v45 = vpop.xlane.xlu0 %1560 }
0x1ebe   :  { %v1573_v43 = vadd.f32 %v1572_v35, %v1561_v45 }
0x1ec0   :  { %v1578_v46 = vadd.f32 %v1665_v38, %v1573_v43 }
0x1ec2   :  { %v1651_v48 = vmul.f32 -1.442695, %v1578_v46 }
0x1ec4   :  { %1750 = vpow2.f32 %v1651_v48 }
0x1eca   :  { %v1751_v40 = vpop.eup %1750 }
0x1ecb   :  { %v1582_v44 = vadd.f32 1.0, %v1751_v40 }
0x1ecd   :  { %1752 = vrcp.f32 %v1582_v44  ;;  %v1594_v55 = vand.u32 2147483648, %v1582_v44  ;;  %v1592_v42 = vand.u32 2147483647, %v1582_v44  ;;  %vm1588_vm10 = vweird.f32 %v1582_v44 }
0x1ecf   :  { %v1595_v32 = vor.u32 1.1754944e-38, %v1594_v55  ;;  %vm1593_vm13 = vcmp.eq.f32.partialorder %v1592_v42, 8.507059e+37 }
0x1ed3   :  { %v1753_v30 = vpop.eup %1752 }
0x1ed4   :  { %v1584_v18 = vmul.f32 %v1753_v30, %v1582_v44  ;;  %vm1589_vm9 = vweird.f32 %v1753_v30 }
0x1ed5   :  { %vm1590_vm12 = vmor %vm1588_vm10, %vm1589_vm9 }
0x1ed6   :  { %v1585_v47 = vsub.f32 1.0, %v1584_v18 }
0x1ed8   :  { %v1586_v11 = vmul.f32 %v1753_v30, %v1585_v47 }
0x1eda   :  { %v1587_v13 = vadd.f32 %v1753_v30, %v1586_v11 }
0x1edc   :  { %v1591_v49 = vsel %vm1590_vm12, %v1753_v30, %v1587_v13 }
0x1edd   :  { %v1596_v50 = vsel %vm1593_vm13, %v1595_v32, %v1591_v49 }
0x1ede   :  { %1599 = vst.msk [vmem:[%s2566_s10] sm:$0x3] %vm1598_vm11, %v1596_v50 }
0x1edf   :  { %1604 = vsyncpa [#allocation4], 1 }
0x1ee0   :  { %1605 = vsyncpa [#allocation6], 1 }

</bundles_post_ra>
